<compile_context>
chip_gen: v7x
topology: tpu7x:2x2x1
jax: 0.10.0
libtpu: 0.0.40
codegen_flags: <defaults>
</compile_context>

<pallas_src>
import functools

import jax
import jax.numpy as jnp
from jax.experimental import pallas as pl
from jax.experimental.pallas import tpu as pltpu

EXPANSION = 32          # block.expansion in the reference
MAX_TN = 2048           # lane-dense output tiles; biggest B tile = (1024,2048) bf16 = 4 MiB
MAX_TK = 1024           # -> double-buffered footprint ~8.5 MiB < 16 MiB v5e scoped default


def _round_up(x, m):
    return ((x + m - 1) // m) * m


# ---------------------------------------------------------------------------
# Pallas kernels
# ---------------------------------------------------------------------------
def _accumulate(a_ref, b_ref, acc_ref):
    @pl.when(pl.program_id(1) == 0)
    def _():
        acc_ref[...] = jnp.zeros_like(acc_ref)

    acc_ref[...] += jnp.dot(a_ref[...], b_ref[...],
                            preferred_element_type=jnp.float32)


def _bn_finalize(acc, gamma, beta, m_real, eps):
    # Batch-statistics BN over the real rows.  Padded rows are exact zeros
    # (convs have no bias), so plain sums divided by m_real give exact stats.
    inv_m = 1.0 / float(m_real)
    mean = jnp.sum(acc, axis=0, keepdims=True) * inv_m
    var = jnp.sum(acc * acc, axis=0, keepdims=True) * inv_m - mean * mean
    inv_std = jax.lax.rsqrt(jnp.maximum(var, 0.0) + eps)
    return (acc - mean) * (inv_std * gamma) + beta


def _conv_bn_kernel(a_ref, b_ref, g_ref, bt_ref, o_ref, acc_ref, *,
                    m_real, eps, relu):
    _accumulate(a_ref, b_ref, acc_ref)

    @pl.when(pl.program_id(1) == pl.num_programs(1) - 1)
    def _():
        y = _bn_finalize(acc_ref[...], g_ref[...], bt_ref[...], m_real, eps)
        if relu:
            y = jnp.maximum(y, 0.0)
        o_ref[...] = y.astype(o_ref.dtype)


def _conv_bn_res_kernel(a_ref, b_ref, g_ref, bt_ref, r_ref, o_ref, acc_ref, *,
                        m_real, eps):
    _accumulate(a_ref, b_ref, acc_ref)

    @pl.when(pl.program_id(1) == pl.num_programs(1) - 1)
    def _():
        y = _bn_finalize(acc_ref[...], g_ref[...], bt_ref[...], m_real, eps)
        y = jnp.maximum(y, 0.0)                          # ReLU after bn3
        y = y + r_ref[...]                               # residual add
        o_ref[...] = jnp.maximum(y, 0.0).astype(o_ref.dtype)   # final ReLU


def _fc_kernel(a_ref, b_ref, bias_ref, o_ref, acc_ref):
    _accumulate(a_ref, b_ref, acc_ref)

    @pl.when(pl.program_id(1) == pl.num_programs(1) - 1)
    def _():
        o_ref[...] = (acc_ref[...] + bias_ref[...]).astype(o_ref.dtype)


def _max9_kernel(*refs):
    o_ref = refs[-1]
    m = refs[0][...]
    for r in refs[1:-1]:
        m = jnp.maximum(m, r[...])
    o_ref[...] = m


def _spatial_mean_kernel(x_ref, o_ref, *, inv_hw):
    o_ref[...] = (jnp.sum(x_ref[...], axis=1) * inv_hw).astype(o_ref.dtype)


# ---------------------------------------------------------------------------
# Fused matmul launcher (bf16 MXU, adaptive tiles, reduction axis last)
# ---------------------------------------------------------------------------
def _launch_matmul(kernel, a, w, row_vecs, residual=None):
    """a:(M,K), w:(K,N); row_vecs: list of per-column (N,) f32 params;
    residual: optional (M,N) f32.  Returns (M,N) f32."""
    M, K = a.shape
    N = w.shape[1]
    TM = _round_up(M, 8)                       # full M lives in one tile
    assert TM <= 512, "row dimension must fit in a single tile (BN epilogue)"
    TN = min(_round_up(N, 128), MAX_TN)
    TK = _round_up(K, 128) if K <= MAX_TK else MAX_TK
    Kp, Np = _round_up(K, TK), _round_up(N, TN)

    a = a.astype(jnp.bfloat16)
    if (TM, Kp) != (M, K):
        a = jnp.pad(a, ((0, TM - M), (0, Kp - K)))
    w = w.astype(jnp.bfloat16)
    if (Kp, Np) != (K, N):
        w = jnp.pad(w, ((0, Kp - K), (0, Np - N)))

    inputs = [a, w]
    in_specs = [pl.BlockSpec((TM, TK), lambda j, k: (0, k)),
                pl.BlockSpec((TK, TN), lambda j, k: (k, j))]
    for v in row_vecs:                                  # gamma/beta or bias (f32)
        v2 = v.reshape(1, N).astype(jnp.float32)
        if Np != N:
            v2 = jnp.pad(v2, ((0, 0), (0, Np - N)))
        inputs.append(v2)
        in_specs.append(pl.BlockSpec((1, TN), lambda j, k: (0, j)))
    if residual is not None:
        r = residual.astype(jnp.float32)
        if r.shape != (TM, Np):
            r = jnp.pad(r, ((0, TM - r.shape[0]), (0, Np - r.shape[1])))
        inputs.append(r)
        in_specs.append(pl.BlockSpec((TM, TN), lambda j, k: (0, j)))

    out = pl.pallas_call(
        kernel,
        out_shape=jax.ShapeDtypeStruct((TM, Np), jnp.float32),
        grid_spec=pltpu.PrefetchScalarGridSpec(
            num_scalar_prefetch=0,
            grid=(Np // TN, Kp // TK),                  # reduction axis last
            in_specs=in_specs,
            out_specs=pl.BlockSpec((TM, TN), lambda j, k: (0, j)),
            scratch_shapes=[pltpu.VMEM((TM, TN), jnp.float32)],
        ),
        compiler_params=pltpu.CompilerParams(
            dimension_semantics=("parallel", "arbitrary")),
    )(*inputs)
    return out[:M, :N]


# ---------------------------------------------------------------------------
# Conv / pooling wrappers (im2col & window extraction are glue; math is Pallas)
# ---------------------------------------------------------------------------
def _im2col(x4, k, stride, padding, OH, OW):
    N, H, W, C = x4.shape
    if k == 1 and padding == 0:
        if stride != 1:
            x4 = x4[:, ::stride, ::stride, :]
        return x4.reshape(N * OH * OW, C)               # pure view, no 9x blowup
    if padding > 0:
        x4 = jnp.pad(x4, ((0, 0), (padding, padding), (padding, padding), (0, 0)))
    # TODO(synk): at large spatial sizes, fold the (kh,kw) taps into the matmul
    #             k-grid instead of materializing the k*k patch tensor in HBM.
    cols = [x4[:, kh:kh + stride * (OH - 1) + 1:stride,
               kw:kw + stride * (OW - 1) + 1:stride, :]
            for kh in range(k) for kw in range(k)]
    return jnp.concatenate(cols, axis=-1).reshape(N * OH * OW, k * k * C)


def conv_bn(x4, w_mat, gamma, beta, *, k, stride, padding, relu=True,
            residual=None, eps=1e-5):
    """Conv (no bias; BN cancels it) + BatchNorm(batch stats) [+ReLU][+residual+ReLU],
    all fused into one Pallas matmul kernel."""
    N, H, W, Cin = x4.shape
    OH = (H + 2 * padding - k) // stride + 1
    OW = (W + 2 * padding - k) // stride + 1
    Cout = w_mat.shape[1]
    patches = _im2col(x4, k, stride, padding, OH, OW)
    m_real = N * OH * OW
    if residual is not None:
        kern = functools.partial(_conv_bn_res_kernel, m_real=m_real, eps=eps)
        out2d = _launch_matmul(kern, patches, w_mat, [gamma, beta], residual=residual)
    else:
        kern = functools.partial(_conv_bn_kernel, m_real=m_real, eps=eps, relu=relu)
        out2d = _launch_matmul(kern, patches, w_mat, [gamma, beta])
    return out2d, (N, OH, OW, Cout)


def linear(x2d, w_mat, bias):
    return _launch_matmul(_fc_kernel, x2d, w_mat, [bias])


def maxpool_3x3_s2_p1(x4):
    N, H, W, C = x4.shape
    OH = (H + 2 - 3) // 2 + 1
    OW = (W + 2 - 3) // 2 + 1
    xp = jnp.pad(x4, ((0, 0), (1, 1), (1, 1), (0, 0)), constant_values=-jnp.inf)
    wins = [xp[:, kh:kh + 2 * (OH - 1) + 1:2,
               kw:kw + 2 * (OW - 1) + 1:2, :].reshape(N * OH * OW, C)
            for kh in range(3) for kw in range(3)]
    out2d = pl.pallas_call(
        _max9_kernel,
        out_shape=jax.ShapeDtypeStruct((N * OH * OW, C), x4.dtype))(*wins)
    return out2d, (N, OH, OW, C)


def adaptive_avgpool_1x1(y2d, shape):
    N, H, W, C = shape
    if H * W == 1:                                      # post-layer4 spatial is 1x1 here
        return y2d
    return pl.pallas_call(
        functools.partial(_spatial_mean_kernel, inv_hw=1.0 / (H * W)),
        out_shape=jax.ShapeDtypeStruct((N, C), jnp.float32),
    )(y2d.reshape(N, H * W, C))


# ---------------------------------------------------------------------------
# Parameters (conv weights stored pre-reshaped to (k*k*Cin, Cout) in bf16)
# ---------------------------------------------------------------------------
def _conv_params(key, cin, cout, k):
    scale = float(cin * k * k) ** -0.5
    return {"w": jax.random.normal(key, (k * k * cin, cout), jnp.bfloat16) * scale}


def _bn_params(c):
    return {"gamma": jnp.ones((c,), jnp.float32),
            "beta": jnp.zeros((c,), jnp.float32)}


def init_params(key, layers=(1, 1, 1, 1), num_classes=10):
    keys = iter(jax.random.split(key, 256))
    params = {"conv1": _conv_params(next(keys), 32, 64, 7),   # reference hardcodes 32 in-channels
              "bn1": _bn_params(64),
              "layers": []}
    in_c = 64
    layer_cfg = [(64, 1), (124, 2), (256, 2), (512, 2)]
    for (out_c, stride), nblocks in zip(layer_cfg, layers):
        blocks = []
        for bi in range(nblocks):
            s = stride if bi == 0 else 1
            blk = {
                "stride": s,
                "conv1": _conv_params(next(keys), in_c, out_c, 1),
                "bn1": _bn_params(out_c),
                "conv2": _conv_params(next(keys), out_c, out_c, 3),
                "bn2": _bn_params(out_c),
                "conv3": _conv_params(next(keys), out_c, out_c * EXPANSION, 1),
                "bn3": _bn_params(out_c * EXPANSION),
            }
            if s != 1 or in_c != out_c * EXPANSION:
                blk["ds_conv"] = _conv_params(next(keys), in_c, out_c * EXPANSION, 1)
                blk["ds_bn"] = _bn_params(out_c * EXPANSION)
            blocks.append(blk)
            in_c = out_c * EXPANSION
        params["layers"].append(blocks)
    params["fc_w"] = (jax.random.normal(next(keys), (512 * EXPANSION, num_classes),
                                        jnp.bfloat16) * (512 * EXPANSION) ** -0.5)
    params["fc_b"] = jnp.zeros((num_classes,), jnp.float32)
    return params


# ---------------------------------------------------------------------------
# Model forward
# ---------------------------------------------------------------------------
def block_forward(x2d, shape, blk):
    N, H, W, C = shape
    x4 = x2d.reshape(N, H, W, C)

    y2d, s1 = conv_bn(x4, blk["conv1"]["w"], blk["bn1"]["gamma"], blk["bn1"]["beta"],
                      k=1, stride=1, padding=0, relu=True)
    y2d, s2 = conv_bn(y2d.reshape(s1), blk["conv2"]["w"],
                      blk["bn2"]["gamma"], blk["bn2"]["beta"],
                      k=3, stride=blk["stride"], padding=1, relu=True)

    if "ds_conv" in blk:
        id2d, _ = conv_bn(x4, blk["ds_conv"]["w"],
                          blk["ds_bn"]["gamma"], blk["ds_bn"]["beta"],
                          k=1, stride=blk["stride"], padding=0, relu=False)
    else:
        id2d = x2d

    # conv3 + bn3 + ReLU + residual add + final ReLU in ONE fused kernel epilogue
    y2d, s3 = conv_bn(y2d.reshape(s2), blk["conv3"]["w"],
                      blk["bn3"]["gamma"], blk["bn3"]["beta"],
                      k=1, stride=1, padding=0, residual=id2d)
    return y2d, s3


def resnet_forward(x_nchw, params):
    x = jnp.transpose(x_nchw, (0, 2, 3, 1)).astype(jnp.float32)   # NCHW -> NHWC

    y2d, shape = conv_bn(x, params["conv1"]["w"],
                         params["bn1"]["gamma"], params["bn1"]["beta"],
                         k=7, stride=2, padding=3, relu=True)
    y2d, shape = maxpool_3x3_s2_p1(y2d.reshape(shape))

    for layer_blocks in params["layers"]:
        for blk in layer_blocks:
            y2d, shape = block_forward(y2d, shape, blk)

    pooled = adaptive_avgpool_1x1(y2d, shape)                     # (N, 512*32)
    logits = linear(pooled, params["fc_w"], params["fc_b"])       # Linear(512*32, classes)
    return logits


if __name__ == "__main__":
    key = jax.random.PRNGKey(0)
    pkey, xkey = jax.random.split(key)
    params = init_params(pkey, layers=(1, 1, 1, 1), num_classes=10)
    # conv1 in the reference requires 32 input channels; small spatial size 16.
    x = jax.random.normal(xkey, (2, 32, 16, 16), jnp.float32)     # NCHW
    logits = resnet_forward(x, params)
    jax.block_until_ready(logits)
    assert logits.shape == (2, 10)
    assert bool(jnp.all(jnp.isfinite(logits)))
    print("KERNEL_OK")
</pallas_src>

<mosaic_0001>
module attributes {stable_mosaic.version = 11 : i64} {
  func.func @_conv_bn_kernel(%arg0: i32, %arg1: i32, %arg2: memref<128x1024xbf16, #tpu.memory_space<vmem>>, %arg3: memref<1024x128xbf16, #tpu.memory_space<vmem>>, %arg4: memref<1x128xf32, #tpu.memory_space<vmem>>, %arg5: memref<1x128xf32, #tpu.memory_space<vmem>>, %arg6: memref<128x128xf32, #tpu.memory_space<vmem>>, %arg7: memref<128x128xf32, #tpu.memory_space<vmem>>) attributes {dimension_semantics = [#tpu.dimension_semantics<parallel>, #tpu.dimension_semantics<arbitrary>], iteration_bounds = array<i64: 1, 2>, scalar_prefetch = 0 : i64, scratch_operands = 1 : i64, tpu.core_type = #tpu.core_type<tc>, window_params = [{transform_indices = @transform_0, window_bounds = array<i64: 128, 1024>}, {transform_indices = @transform_1, window_bounds = array<i64: 1024, 128>}, {transform_indices = @transform_2, window_bounds = array<i64: 1, 128>}, {transform_indices = @transform_3, window_bounds = array<i64: 1, 128>}, {transform_indices = @transform_4, window_bounds = array<i64: 128, 128>}]} {
    %c0_i32 = arith.constant 0 : i32
    %0 = arith.cmpi eq, %arg1, %c0_i32 : i32
    %1 = arith.extui %0 : i1 to i32
    %c0_i32_0 = arith.constant 0 : i32
    %2 = arith.cmpi ne, %1, %c0_i32_0 : i32
    scf.if %2 {
      %cst_9 = arith.constant 0.000000e+00 : f32
      %12 = vector.broadcast %cst_9 : f32 to vector<128x128xf32>
      %c0_10 = arith.constant 0 : index
      %c0_11 = arith.constant 0 : index
      %13 = vector.load %arg7[%c0_10, %c0_11] : memref<128x128xf32, #tpu.memory_space<vmem>>, vector<128x128xf32>
      tpu.vector_store %arg7[%c0_10, %c0_11], %12 {strides = array<i32>} : memref<128x128xf32, #tpu.memory_space<vmem>>, vector<128x128xf32>,
    } else {
    }
    %c0 = arith.constant 0 : index
    %c0_1 = arith.constant 0 : index
    %3 = vector.load %arg7[%c0, %c0_1] : memref<128x128xf32, #tpu.memory_space<vmem>>, vector<128x128xf32>
    %c0_2 = arith.constant 0 : index
    %c0_3 = arith.constant 0 : index
    %4 = vector.load %arg2[%c0_2, %c0_3] : memref<128x1024xbf16, #tpu.memory_space<vmem>>, vector<128x1024xbf16>
    %c0_4 = arith.constant 0 : index
    %c0_5 = arith.constant 0 : index
    %5 = vector.load %arg3[%c0_4, %c0_5] : memref<1024x128xbf16, #tpu.memory_space<vmem>>, vector<1024x128xbf16>
    %cst = arith.constant dense<0.000000e+00> : vector<128x128xf32>
    %6 = tpu.matmul %4, %5, %cst {dimension_numbers = #tpu.dot_dimension_numbers<[1], [0], [0], [1], [0, 0, 1, 1], [], []>} : vector<128x1024xbf16>, vector<1024x128xbf16>, vector<128x128xf32> -> vector<128x128xf32>
    %7 = arith.addf %3, %6 : vector<128x128xf32>
    %c0_6 = arith.constant 0 : index
    %c0_7 = arith.constant 0 : index
    %8 = vector.load %arg7[%c0_6, %c0_7] : memref<128x128xf32, #tpu.memory_space<vmem>>, vector<128x128xf32>
    tpu.vector_store %arg7[%c0_6, %c0_7], %7 {strides = array<i32>} : memref<128x128xf32, #tpu.memory_space<vmem>>, vector<128x128xf32>,
    %c1_i32 = arith.constant 1 : i32
    %9 = arith.cmpi eq, %arg1, %c1_i32 : i32
    %10 = arith.extui %9 : i1 to i32
    %c0_i32_8 = arith.constant 0 : i32
    %11 = arith.cmpi ne, %10, %c0_i32_8 : i32
    scf.if %11 {
      %c0_9 = arith.constant 0 : index
      %c0_10 = arith.constant 0 : index
      %12 = vector.load %arg7[%c0_9, %c0_10] : memref<128x128xf32, #tpu.memory_space<vmem>>, vector<128x128xf32>
      %c0_11 = arith.constant 0 : index
      %c0_12 = arith.constant 0 : index
      %13 = vector.load %arg4[%c0_11, %c0_12] : memref<1x128xf32, #tpu.memory_space<vmem>>, vector<1x128xf32>
      %c0_13 = arith.constant 0 : index
      %c0_14 = arith.constant 0 : index
      %14 = vector.load %arg5[%c0_13, %c0_14] : memref<1x128xf32, #tpu.memory_space<vmem>>, vector<1x128xf32>
      %cst_15 = arith.constant dense<0.000000e+00> : vector<128xf32>
      %15 = vector.multi_reduction <add>, %12, %cst_15 [0] : vector<128x128xf32> to vector<128xf32>
      %16 = vector.shape_cast %15 : vector<128xf32> to vector<1x128xf32>
      %cst_16 = arith.constant 7.812500e-03 : f32
      %17 = vector.broadcast %cst_16 : f32 to vector<1x128xf32>
      %18 = arith.mulf %16, %17 : vector<1x128xf32>
      %19 = arith.mulf %12, %12 : vector<128x128xf32>
      %cst_17 = arith.constant dense<0.000000e+00> : vector<128xf32>
      %20 = vector.multi_reduction <add>, %19, %cst_17 [0] : vector<128x128xf32> to vector<128xf32>
      %21 = vector.shape_cast %20 : vector<128xf32> to vector<1x128xf32>
      %cst_18 = arith.constant 7.812500e-03 : f32
      %22 = vector.broadcast %cst_18 : f32 to vector<1x128xf32>
      %23 = arith.mulf %21, %22 : vector<1x128xf32>
      %24 = arith.mulf %18, %18 : vector<1x128xf32>
      %25 = arith.subf %23, %24 : vector<1x128xf32>
      %cst_19 = arith.constant 0.000000e+00 : f32
      %26 = vector.broadcast %cst_19 : f32 to vector<1x128xf32>
      %27 = arith.maximumf %25, %26 : vector<1x128xf32>
      %cst_20 = arith.constant 9.99999974E-6 : f32
      %28 = vector.broadcast %cst_20 : f32 to vector<1x128xf32>
      %29 = arith.addf %27, %28 : vector<1x128xf32>
      %30 = math.rsqrt %29 : vector<1x128xf32>
      %31 = vector.broadcast %18 : vector<1x128xf32> to vector<128x128xf32>
      %32 = arith.subf %12, %31 : vector<128x128xf32>
      %33 = arith.mulf %30, %13 : vector<1x128xf32>
      %34 = vector.broadcast %33 : vector<1x128xf32> to vector<128x128xf32>
      %35 = arith.mulf %32, %34 : vector<128x128xf32>
      %36 = vector.broadcast %14 : vector<1x128xf32> to vector<128x128xf32>
      %37 = arith.addf %35, %36 : vector<128x128xf32>
      %cst_21 = arith.constant 0.000000e+00 : f32
      %38 = vector.broadcast %cst_21 : f32 to vector<128x128xf32>
      %39 = arith.maximumf %37, %38 : vector<128x128xf32>
      %c0_22 = arith.constant 0 : index
      %c0_23 = arith.constant 0 : index
      %40 = vector.load %arg6[%c0_22, %c0_23] : memref<128x128xf32, #tpu.memory_space<vmem>>, vector<128x128xf32>
      tpu.vector_store %arg6[%c0_22, %c0_23], %39 {strides = array<i32>} : memref<128x128xf32, #tpu.memory_space<vmem>>, vector<128x128xf32>,
    } else {
    }
    return
  }
  func.func @transform_0(%arg0: i32, %arg1: i32) -> (i32, i32) {
    %c0_i32 = arith.constant 0 : i32
    %c0_i32_0 = arith.constant 0 : i32
    return %c0_i32, %arg1 : i32, i32
  }
  func.func @transform_1(%arg0: i32, %arg1: i32) -> (i32, i32) {
    %c0_i32 = arith.constant 0 : i32
    return %arg1, %arg0 : i32, i32
  }
  func.func @transform_2(%arg0: i32, %arg1: i32) -> (i32, i32) {
    %c0_i32 = arith.constant 0 : i32
    %c0_i32_0 = arith.constant 0 : i32
    return %c0_i32, %arg0 : i32, i32
  }
  func.func @transform_3(%arg0: i32, %arg1: i32) -> (i32, i32) {
    %c0_i32 = arith.constant 0 : i32
    %c0_i32_0 = arith.constant 0 : i32
    return %c0_i32, %arg0 : i32, i32
  }
  func.func @transform_4(%arg0: i32, %arg1: i32) -> (i32, i32) {
    %c0_i32 = arith.constant 0 : i32
    %c0_i32_0 = arith.constant 0 : i32
    return %c0_i32, %arg0 : i32, i32
  }
}

</mosaic_0001>

<bundles_post_ra>
// kernel: tpu_custom_call.1
= control target key start
LH: loop header
LB: loop body
LE: loop exit
PB: predicated region body
PF: predicated region fallthrough
CT: control target
= control target key end

     0   :  { %9 = vsyncpa [#allocation4], 0  ;;  %s3182_s0 = inlined_call_operand.hbm [shape: bf16[128,2048], index: 0, kind: input, shape index: {}]   ;;  %s3183_s1 = inlined_call_operand.hbm [shape: bf16[2048,128], index: 1, kind: input, shape index: {}]   ;;  %s3184_s2 = inlined_call_operand.vmem [shape: f32[1,128], index: 2, kind: input, shape index: {}]   ;;  %s3185_s3 = inlined_call_operand.vmem [shape: f32[1,128], index: 3, kind: input, shape index: {}]   ;;  %s3186_s4 = inlined_call_operand.hbm [shape: f32[128,128], index: 4, kind: output, shape index: {}]  }
   0x1   :  { %11 = vsyncpa [#allocation4 + $0x1], 0 }
   0x2   :  { %12 = vsyncpa [#allocation7], 0 }
   0x3   :  { %14 = vsyncpa [#allocation7 + $0x1], 0 }
   0x4   :  { %15 = vsyncpa [#allocation5], 0  ;;  %s2676_s15 = smov 0   ;;  %s2678_s16 = smov 0  }
   0x5   :  { %s2680_s17 = smov 0   ;;  %s2682_s18 = smov 0  }
   0x6   :  { %s2684_s19 = smov 0   ;;  %s2686_s20 = smov 0  }
   0x7 LB: > { %s1946_s21 = sadd.s32 4294967295, %s2638_s20   ;;  %s30_s22 = sadd.s32 1, %s2634_s19  ;;  %s2638_s20 = sphi %s2686_s20, %s21_s20   ;;  %s2634_s19 = sphi %s2684_s19, %s3199_s19   ;;  %s2630_s18 = sphi %s2682_s18, %s3198_s18   ;;  %s2626_s17 = sphi %s2680_s17, %s3197_s17   ;;  %s2622_s16 = sphi %s2678_s16, %s3196_s16   ;;  %s2618_s15 = sphi %s2676_s15, %s3195_s15  }
   0x8   : > { %p31_p0 = scmp.ge.s32.totalorder %s30_s22, 2  ;;  %s40_s23 = sadd.s32 1, %s2626_s17 }
   0x9   : > { %p47_p1 = scmp.ne.s32.totalorder %s2626_s17, %s2622_s16  ;;  %p48_p2 = scmp.eq.s32.totalorder %s2638_s20, 0 }
   0xa   : > { %s3201_s22 = smov (%p31_p0, %s30_s22), 0  ;;  %p53_p4 = scmp.ne.s32.totalorder %s2622_s16, %s2618_s15 }
   0xb   : > { %p2712_p3 = por %p48_p2, %p47_p1  ;;  %s37_s25 = ssub.s32 %s2634_s19, %s3201_s22 }
   0xc   : > { %p54_p5 = scmp.eq.s32.totalorder %s1946_s21, 0  ;;  %p38_p6 = scmp.eq.s32.totalorder %s37_s25, 0 }
   0xd   : > { %p2368_p8 = scmp.lt.s32.totalorder %s2638_s20, 2  ;;  %s2730_s28 = sand.u32 1, %s2626_s17  }
   0xe   : > { %p2721_p7 = por %p54_p5, %p53_p4  ;;  %s2095_s29 = sshll.u32 %s2634_s19, 9 }
   0xf   : > { %s2727_s27 = scalar_select %p38_p6, %s2626_s17, %s40_s23  }
  0x10   : > { %s3189_s26 = scalar_select %p2721_p7, 1, 0 }
  0x11   : > { %s1951_s30 = sshll.u32 %s2730_s28, 9  ;;  %s2737_s7 = scalar_lea.hbm %s3182_s0, %s2095_s29 }
  0x12   : > { %s199_s8 = scalar_lea.vmem [#allocation3], %s1951_s30  ;;  %p2743_p9 = pnand %p2368_p8, %p2712_p3 }
  0x13   : > { %s206_s9 = sshll.u32 %s199_s8, 4  ;;  %s196_s11 = scalar_lea.sflag [#allocation4], %s2730_s28  ;;  %s2747_s9 = int_to_ptr.vmem [resolvable:$true] %s206_s9 }
  0x14   : > { %s2494_s12 = scalar_lea.hbm %s2737_s7, 8192  ;;  %p2496_p12 = pneg %p2743_p9 }
  0x15   : > { %p2495_p11 = scmp.ne.s32.totalorder %s2737_s7, %s2494_s12  ;;  %s2499_s15 = scalar_lea.hbm %s3182_s0, 16384 }
  0x16   : > { %p2500_p1 = scmp.lt.u32.totalorder %s2737_s7, %s3182_s0  ;;  %p2501_p2 = scmp.lt.u32.totalorder %s2499_s15, %s2494_s12 }
  0x17   : > { %p2497_p13 = pnand %p2496_p12, %p2495_p11  ;;  %p2503_p4 = scmp.lt.u32.totalorder %s2494_s12, %s2737_s7 }
  0x18   : > { %p2502_p3 = por %p2501_p2, %p2500_p1 }
  0x19   : > { %p2498_p0 = pneg %p2497_p13 }
  0x1a   : > { %p2504_p5 = por %p2503_p4, %p2502_p3 }
  0x1c   : > { %p2505_p6 = pnand %p2504_p5, %p2498_p0 }
  0x1e   : > { %2508 = shalt.err (!%p2505_p6)
}
  0x1f   : > { %s2509_s25 = scalar_lea.vmem %s2747_s9, 8192  ;;  %s2640_s29 = smov [#allocation3]  }
  0x20   : > { %p2510_p8 = scmp.ne.s32.totalorder %s2747_s9, %s2509_s25  ;;  %s2514_s5 = sshll.u32 %s2640_s29, 4  ;;  %s2515_s5 = int_to_ptr.vmem [resolvable:$false] %s2514_s5 }
  0x21   : > { %s2516_s6 = scalar_lea.vmem %s2515_s5, 16384  ;;  %p2517_p10 = scmp.lt.s32.totalorder %s2747_s9, %s2515_s5 }
  0x22   : > { %p2512_p11 = pnand %p2510_p8, %p2496_p12  ;;  %p2518_p1 = scmp.lt.s32.totalorder %s2516_s6, %s2509_s25 }
  0x24   : > { %p2513_p13 = pneg %p2512_p11  ;;  %p2519_p2 = por %p2518_p1, %p2517_p10 }
  0x26   : > { %p2520_p3 = pnand %p2519_p2, %p2513_p13 }
  0x28   : > { %2523 = shalt.err (!%p2520_p3)
}
  0x29   : > { %s2641_s8 = smov 1024   ;;  %s2642_s12 = smov 512  }
  0x2a   : > { %s2643_s13 = smov 32   ;;  %p236_p0 = scmp.lt.s32.totalorder %s2638_s20, 3 }
  0x2b   : > { %2364 = dma.hbm_to_vmem [thread:$0]  (!%p2743_p9), %s2737_s7, 8192, %s2747_s9, %s196_s11, %s2641_s8, %s2642_s12, %s2643_s13  }
  0x2c   : > { %s2096_s14 = sshll.u32 %s2634_s19, 13  ;;  %p3191_p10 = scmp.ge.s32.totalorder %s2638_s20, 1 }
  0x2d   : > { %s2789_s25 = scalar_lea.hbm %s3183_s1, %s2096_s14  ;;  %s220_s29 = scalar_lea.vmem [#allocation6], %s1951_s30 }
  0x2e   : > { %p2782_p4 = pnand %p3191_p10, %p236_p0  ;;  %s228_s5 = sshll.u32 %s220_s29, 4  ;;  %s2793_s5 = int_to_ptr.vmem [resolvable:$true] %s228_s5 }
  0x2f   : > { %s217_s7 = scalar_lea.sflag [#allocation7], %s2730_s28  ;;  %s2524_s9 = scalar_lea.hbm %s2789_s25, 8192 }
  0x30   : > { %p2525_p5 = scmp.ne.s32.totalorder %s2789_s25, %s2524_s9  ;;  %s2529_s8 = scalar_lea.hbm %s3183_s1, 16384 }
  0x31   : > { %p2530_p11 = scmp.lt.u32.totalorder %s2789_s25, %s3183_s1  ;;  %p2531_p13 = scmp.lt.u32.totalorder %s2529_s8, %s2524_s9 }
  0x32   : > { %p2527_p6 = pnand %p2525_p5, %p2496_p12  ;;  %p2533_p2 = scmp.lt.u32.totalorder %s2524_s9, %s2789_s25 }
  0x33   : > { %p2532_p1 = por %p2531_p13, %p2530_p11 }
  0x34   : > { %p2528_p8 = pneg %p2527_p6 }
  0x35   : > { %p2534_p3 = por %p2533_p2, %p2532_p1 }
  0x37   : > { %p2535_p0 = pnand %p2534_p3, %p2528_p8 }
  0x39   : > { %2538 = shalt.err (!%p2535_p0)
}
  0x3a   : > { %s2539_s30 = scalar_lea.vmem %s2793_s5, 8192  ;;  %s2644_s14 = smov [#allocation6]  }
  0x3b   : > { %p2540_p10 = scmp.ne.s32.totalorder %s2793_s5, %s2539_s30  ;;  %s2544_s23 = sshll.u32 %s2644_s14, 4  ;;  %s2545_s23 = int_to_ptr.vmem [resolvable:$false] %s2544_s23 }
  0x3c   : > { %s2546_s24 = scalar_lea.vmem %s2545_s23, 16384  ;;  %p2547_p7 = scmp.lt.s32.totalorder %s2793_s5, %s2545_s23 }
  0x3d   : > { %p2542_p5 = pnand %p2540_p10, %p2496_p12  ;;  %p2548_p11 = scmp.lt.s32.totalorder %s2546_s24, %s2539_s30 }
  0x3f   : > { %p2543_p6 = pneg %p2542_p5  ;;  %p2549_p13 = por %p2548_p11, %p2547_p7 }
  0x41   : > { %p2550_p1 = pnand %p2549_p13, %p2543_p6 }
  0x43   : > { %2553 = shalt.err (!%p2550_p1)
}
  0x44   : > { %s2645_s29 = smov 64   ;;  %s2646_s9 = smov 4  }
  0x45   : > { %2367 = dma.hbm_to_vmem [thread:$0]  (!%p2743_p9), %s2789_s25, 8192, %s2793_s5, %s217_s7, %s2645_s29, %s2645_s29, %s2646_s9  }
  0x46   : > { %240 = sbr.rel (%p2782_p4) target bundleno = 571 (0x23b), region = 36  ;;  %s242_s11 = sand.u32 (!%p2782_p4), 1, %s2622_s16  }
  0x47   : > { %s1958_s6 = sshll.u32 (!%p2782_p4), %s242_s11, 9  ;;  %s243_s8 = scalar_lea.sflag (!%p2782_p4), [#allocation4], %s242_s11 }
  0x48   : > { %s2824_s12 = scalar_lea.vmem (!%p2782_p4), [#allocation3], %s1958_s6  ;;  %p3193_p7 = scmp.ne.s32.totalorder (!%p2782_p4), %s3189_s26, 0 }
  0x4d   : > { %2605 = dma.done.wait (%p3193_p7), %s243_s8, 8192  }
  0x4e   : > { %2607 = vsyncadd (%p3193_p7), %s243_s8, 4294959104  ;;  %s252_s13 = scalar_lea.sflag [#allocation7], %s242_s11  ;;  %s2830_s10 = scalar_lea.vmem [#allocation6], %s1958_s6 }
  0x4f   : > { %2609 = dma.done.wait (%p3193_p7), %s252_s13, 8192  }
  0x50   : > { %2611 = vsyncadd (%p3193_p7), %s252_s13, 4294959104  ;;  %p1960_p9 = scmp.ne.s32.totalorder %s2630_s18, 0 }
  0x51   : > { %v2647_v0 = vmov (!%p1960_p9), 0.0  }
  0x52   : > { %298 = sbr.rel (%p1960_p9) target bundleno = 90 (0x5a), region = 48  ;;  %299 = vst [vmem:[#allocation2] sm:$0xff] (!%p1960_p9), %v2647_v0  ;;  %300 = vst [vmem:[#allocation2 + $0x8] sm:$0xff] (!%p1960_p9), %v2647_v0 }
  0x53   : > { %301 = vst [vmem:[#allocation2 + $0x10] sm:$0xff] (!%p1960_p9), %v2647_v0  ;;  %302 = vst [vmem:[#allocation2 + $0x18] sm:$0xff] (!%p1960_p9), %v2647_v0 }
  0x54   : > { %303 = vst [vmem:[#allocation2 + $0x20] sm:$0xff] (!%p1960_p9), %v2647_v0  ;;  %304 = vst [vmem:[#allocation2 + $0x28] sm:$0xff] (!%p1960_p9), %v2647_v0 }
  0x55   : > { %305 = vst [vmem:[#allocation2 + $0x30] sm:$0xff] (!%p1960_p9), %v2647_v0  ;;  %306 = vst [vmem:[#allocation2 + $0x38] sm:$0xff] (!%p1960_p9), %v2647_v0 }
  0x56   : > { %307 = vst [vmem:[#allocation2 + $0x40] sm:$0xff] (!%p1960_p9), %v2647_v0  ;;  %308 = vst [vmem:[#allocation2 + $0x48] sm:$0xff] (!%p1960_p9), %v2647_v0 }
  0x57   : > { %309 = vst [vmem:[#allocation2 + $0x50] sm:$0xff] (!%p1960_p9), %v2647_v0  ;;  %310 = vst [vmem:[#allocation2 + $0x58] sm:$0xff] (!%p1960_p9), %v2647_v0 }
  0x58   : > { %311 = vst [vmem:[#allocation2 + $0x60] sm:$0xff] (!%p1960_p9), %v2647_v0  ;;  %312 = vst [vmem:[#allocation2 + $0x68] sm:$0xff] (!%p1960_p9), %v2647_v0 }
  0x59   : > { %313 = vst [vmem:[#allocation2 + $0x70] sm:$0xff] %v2647_v0  ;;  %314 = vst [vmem:[#allocation2 + $0x78] sm:$0xff] %v2647_v0 }
  0x5a PF: > { %v2428_v1 = vld [vmem:[%s2830_s10 + $0x40] sm:$0xff]   ;;  %v2432_v5 = vld [vmem:[%s2830_s10 + $0x48] sm:$0xff]   ;;  %v2436_v9 = vld [vmem:[%s2830_s10 + $0x50] sm:$0xff]   ;;  %p2089_p12 = scmp.ne.s32.totalorder %s2630_s18, 1 }
  0x5b   : > { %v2429_v2 = vld [vmem:[%s2830_s10 + $0xc0] sm:$0xff]   ;;  %2097 = vmatprep.subr.bf16.mxu0 %v2428_v1  ;;  %v2433_v6 = vld [vmem:[%s2830_s10 + $0xc8] sm:$0xff]   ;;  %v2437_v10 = vld [vmem:[%s2830_s10 + $0xd0] sm:$0xff]  }
  0x5c   : > { %v2430_v3 = vld [vmem:[%s2830_s10] sm:$0xff]   ;;  %2161 = vmatprep.subr.bf16.mxu1 %v2429_v2  ;;  %v2434_v7 = vld [vmem:[%s2830_s10 + $0x8] sm:$0xff]   ;;  %v2438_v11 = vld [vmem:[%s2830_s10 + $0x10] sm:$0xff]  }
  0x5d   : > { %v2431_v4 = vld [vmem:[%s2830_s10 + $0x80] sm:$0xff]   ;;  %2098 = vmatpush3.bf16.msra.mxu0 %v2430_v3  ;;  %v2435_v8 = vld [vmem:[%s2830_s10 + $0x88] sm:$0xff]   ;;  %v2439_v12 = vld [vmem:[%s2830_s10 + $0x90] sm:$0xff]  }
  0x5e   : > { %2162 = vmatpush3.bf16.msra.mxu1 %v2431_v4  ;;  %2099 = vmatprep.subr.bf16.mxu0 %v2432_v5  ;;  %v2440_v13 = vld [vmem:[%s2830_s10 + $0x58] sm:$0xff]   ;;  %v2444_v17 = vld [vmem:[%s2830_s10 + $0x60] sm:$0xff]   ;;  %v2448_v21 = vld [vmem:[%s2830_s10 + $0x68] sm:$0xff]  }
  0x5f   : > { %2163 = vmatprep.subr.bf16.mxu1 %v2433_v6  ;;  %v2441_v14 = vld [vmem:[%s2830_s10 + $0xd8] sm:$0xff]   ;;  %v2445_v18 = vld [vmem:[%s2830_s10 + $0xe0] sm:$0xff]   ;;  %v2449_v22 = vld [vmem:[%s2830_s10 + $0xe8] sm:$0xff]  }
  0x60   : > { %v2442_v15 = vld [vmem:[%s2830_s10 + $0x18] sm:$0xff]   ;;  %v2446_v19 = vld [vmem:[%s2830_s10 + $0x20] sm:$0xff]   ;;  %v2450_v23 = vld [vmem:[%s2830_s10 + $0x28] sm:$0xff]  }
  0x61   : > { %2100 = vmatpush3.bf16.msra.mxu0 %v2434_v7  ;;  %v2443_v16 = vld [vmem:[%s2830_s10 + $0x98] sm:$0xff]   ;;  %v2447_v20 = vld [vmem:[%s2830_s10 + $0xa0] sm:$0xff]   ;;  %v2451_v24 = vld [vmem:[%s2830_s10 + $0xa8] sm:$0xff]  }
  0x62   : > { %2164 = vmatpush3.bf16.msra.mxu1 %v2435_v8  ;;  %2101 = vmatprep.subr.bf16.mxu0 %v2436_v9  ;;  %v2452_v25 = vld [vmem:[%s2830_s10 + $0x70] sm:$0xff]   ;;  %v2456_v29 = vld [vmem:[%s2830_s10 + $0x78] sm:$0xff]   ;;  %v331_v33 = vld [vmem:[%s2824_s12] sm:$0xff] }
  0x63   : > { %2165 = vmatprep.subr.bf16.mxu1 %v2437_v10  ;;  %v2453_v26 = vld [vmem:[%s2830_s10 + $0xf0] sm:$0xff]   ;;  %v2457_v30 = vld [vmem:[%s2830_s10 + $0xf8] sm:$0xff]   ;;  %v335_v34 = vld [vmem:[%s2824_s12 + $0x20] sm:$0xff] }
  0x64   : > { %v2454_v27 = vld [vmem:[%s2830_s10 + $0x30] sm:$0xff]   ;;  %v2458_v31 = vld [vmem:[%s2830_s10 + $0x38] sm:$0xff]   ;;  %v332_v35 = vld [vmem:[%s2824_s12 + $0x8] sm:$0xff]  ;;  %v1961_v36 = vcombine.low %v331_v33, %v335_v34  ;;  %v1962_v37 = vcombine.high %v331_v33, %v335_v34 }
  0x65   : > { %2102 = vmatpush3.bf16.msra.mxu0 %v2438_v11  ;;  %v2455_v28 = vld [vmem:[%s2830_s10 + $0xb0] sm:$0xff]   ;;  %v2459_v32 = vld [vmem:[%s2830_s10 + $0xb8] sm:$0xff]   ;;  %v336_v38 = vld [vmem:[%s2824_s12 + $0x28] sm:$0xff] }
  0x66   : > { %2166 = vmatpush3.bf16.msra.mxu1 %v2439_v12  ;;  %2103 = vmatprep.subr.bf16.mxu0 %v2440_v13  ;;  %v1963_v39 = vcombine.low %v332_v35, %v336_v38  ;;  %v1964_v40 = vcombine.high %v332_v35, %v336_v38  ;;  %v2460_v41 = vld [vmem:[%s2830_s10 + $0x140] sm:$0xff]   ;;  %v340_v48 = vld [vmem:[%s2824_s12 + $0x48] sm:$0xff]  ;;  %v2468_v63 = vld [vmem:[%s2830_s10 + $0x150] sm:$0xff]  }
  0x67   : > { %2167 = vmatprep.subr.bf16.mxu1 %v2441_v14  ;;  %1259 = vmatprep.mubr.bf16.mxu0 %v1962_v37  ;;  %v2461_v42 = vld [vmem:[%s2830_s10 + $0x100] sm:$0xff]   ;;  %v344_v49 = vld [vmem:[%s2824_s12 + $0x68] sm:$0xff]  ;;  %v2469_v0 = vld [vmem:[%s2830_s10 + $0x110] sm:$0xff]  }
  0x68   : > { %1356 = vmatprep.mubr.bf16.mxu1 %v1964_v40  ;;  %v2462_v43 = vld [vmem:[%s2830_s10 + $0x1c0] sm:$0xff]   ;;  %v1972_v50 = vcombine.high %v340_v48, %v344_v49  ;;  %v2464_v51 = vld [vmem:[%s2830_s10 + $0x148] sm:$0xff]   ;;  %v1971_v54 = vcombine.low %v340_v48, %v344_v49  ;;  %v2470_v1 = vld [vmem:[%s2830_s10 + $0x1d0] sm:$0xff]  }
  0x69   : > { %2104 = vmatpush3.bf16.msra.mxu0 %v2442_v15  ;;  %v2463_v44 = vld [vmem:[%s2830_s10 + $0x180] sm:$0xff]   ;;  %v2465_v53 = vld [vmem:[%s2830_s10 + $0x108] sm:$0xff]   ;;  %v2471_v2 = vld [vmem:[%s2830_s10 + $0x190] sm:$0xff]  }
  0x6a   : > { %2168 = vmatpush3.bf16.msra.mxu1 %v2443_v16  ;;  %2105 = vmatprep.subr.bf16.mxu0 %v2444_v17  ;;  %v339_v45 = vld [vmem:[%s2824_s12 + $0x40] sm:$0xff]  ;;  %v2466_v55 = vld [vmem:[%s2830_s10 + $0x1c8] sm:$0xff]   ;;  %v2472_v11 = vld [vmem:[%s2830_s10 + $0x158] sm:$0xff]  }
  0x6b   : > { %2169 = vmatprep.subr.bf16.mxu1 %v2445_v18  ;;  %v343_v46 = vld [vmem:[%s2824_s12 + $0x60] sm:$0xff]  ;;  %v2467_v56 = vld [vmem:[%s2830_s10 + $0x188] sm:$0xff]   ;;  %v2473_v12 = vld [vmem:[%s2830_s10 + $0x118] sm:$0xff]  }
  0x6c   : > { %v1970_v47 = vcombine.high %v339_v45, %v343_v46  ;;  %v1969_v52 = vcombine.low %v339_v45, %v343_v46  ;;  %v347_v57 = vld [vmem:[%s2824_s12 + $0x80] sm:$0xff]  ;;  %v348_v59 = vld [vmem:[%s2824_s12 + $0x88] sm:$0xff]  ;;  %v2474_v13 = vld [vmem:[%s2830_s10 + $0x1d8] sm:$0xff]  }
  0x6d   : > { %2106 = vmatpush3.bf16.msra.mxu0 %v2446_v19  ;;  %v351_v58 = vld [vmem:[%s2824_s12 + $0xa0] sm:$0xff]  ;;  %v352_v60 = vld [vmem:[%s2824_s12 + $0xa8] sm:$0xff]  ;;  %v2475_v14 = vld [vmem:[%s2830_s10 + $0x198] sm:$0xff]  }
  0x6e   : > { %2170 = vmatpush3.bf16.msra.mxu1 %v2447_v20  ;;  %2107 = vmatprep.subr.bf16.mxu0 %v2448_v21  ;;  %v1978_v61 = vcombine.high %v347_v57, %v351_v58  ;;  %v1980_v62 = vcombine.high %v348_v59, %v352_v60  ;;  %v1977_v3 = vcombine.low %v347_v57, %v351_v58  ;;  %v355_v4 = vld [vmem:[%s2824_s12 + $0xc0] sm:$0xff]  ;;  %v356_v6 = vld [vmem:[%s2824_s12 + $0xc8] sm:$0xff]  ;;  %v2485_v40 = vld [vmem:[%s2830_s10 + $0x130] sm:$0xff]  }
  0x6f   : > { %2171 = vmatprep.subr.bf16.mxu1 %v2449_v22  ;;  %v359_v5 = vld [vmem:[%s2824_s12 + $0xe0] sm:$0xff]  ;;  %v1979_v7 = vcombine.low %v348_v59, %v352_v60  ;;  %v360_v9 = vld [vmem:[%s2824_s12 + $0xe8] sm:$0xff]  ;;  %v2489_v49 = vld [vmem:[%s2830_s10 + $0x138] sm:$0xff]  }
  0x70   : > { %v1986_v8 = vcombine.high %v355_v4, %v359_v5  ;;  %v1988_v10 = vcombine.high %v356_v6, %v360_v9  ;;  %v363_v15 = vld [vmem:[%s2824_s12 + $0x100] sm:$0xff]  ;;  %v364_v17 = vld [vmem:[%s2824_s12 + $0x108] sm:$0xff]  ;;  %v1985_v20 = vcombine.low %v355_v4, %v359_v5  ;;  %v1987_v22 = vcombine.low %v356_v6, %v360_v9  ;;  %v342_v9 = vld [vmem:[%s2824_s12 + $0x58] sm:$0xff] }
  0x71   : > { %2108 = vmatpush3.bf16.msra.mxu0 %v2450_v23  ;;  %v367_v16 = vld [vmem:[%s2824_s12 + $0x120] sm:$0xff]  ;;  %v368_v18 = vld [vmem:[%s2824_s12 + $0x128] sm:$0xff] }
  0x72   : > { %2172 = vmatpush3.bf16.msra.mxu1 %v2451_v24  ;;  %2109 = vmatprep.subr.bf16.mxu0 %v2452_v25  ;;  %v2476_v19 = vld [vmem:[%s2830_s10 + $0x160] sm:$0xff]   ;;  %v1994_v23 = vcombine.high %v363_v15, %v367_v16  ;;  %v1996_v25 = vcombine.high %v364_v17, %v368_v18  ;;  %v2482_v33 = vld [vmem:[%s2830_s10 + $0x1e8] sm:$0xff]   ;;  %v1993_v35 = vcombine.low %v363_v15, %v367_v16  ;;  %v349_v15 = vld [vmem:[%s2824_s12 + $0x90] sm:$0xff] }
  0x73   : > { %2173 = vmatprep.subr.bf16.mxu1 %v2453_v26  ;;  %v2477_v21 = vld [vmem:[%s2830_s10 + $0x120] sm:$0xff]   ;;  %v2483_v34 = vld [vmem:[%s2830_s10 + $0x1a8] sm:$0xff]   ;;  %v353_v16 = vld [vmem:[%s2824_s12 + $0xb0] sm:$0xff] }
  0x74   : > { %v2478_v24 = vld [vmem:[%s2830_s10 + $0x1e0] sm:$0xff]   ;;  %v380_v45 = vld [vmem:[%s2824_s12 + $0x188] sm:$0xff] }
  0x75   : > { %2110 = vmatpush3.bf16.msra.mxu0 %v2454_v27  ;;  %v2479_v26 = vld [vmem:[%s2830_s10 + $0x1a0] sm:$0xff]   ;;  %v384_v46 = vld [vmem:[%s2824_s12 + $0x1a8] sm:$0xff] }
  0x76   : > { %2174 = vmatpush3.bf16.msra.mxu1 %v2455_v28  ;;  %2111 = vmatprep.subr.bf16.mxu0 %v2456_v29  ;;  %v371_v27 = vld [vmem:[%s2824_s12 + $0x140] sm:$0xff]  ;;  %v2480_v29 = vld [vmem:[%s2830_s10 + $0x168] sm:$0xff]   ;;  %v2011_v60 = vcombine.low %v380_v45, %v384_v46 }
  0x77   : > { %2175 = vmatprep.subr.bf16.mxu1 %v2457_v30  ;;  %v375_v28 = vld [vmem:[%s2824_s12 + $0x160] sm:$0xff]  ;;  %v372_v30 = vld [vmem:[%s2824_s12 + $0x148] sm:$0xff] }
  0x78   : > { %v2002_v37 = vcombine.high %v371_v27, %v375_v28  ;;  %v2001_v48 = vcombine.low %v371_v27, %v375_v28  ;;  %v388_v57 = vld [vmem:[%s2824_s12 + $0x1c8] sm:$0xff]  ;;  %v1981_v27 = vcombine.low %v349_v15, %v353_v16 }
  0x79   : > { %2112 = vmatpush3.bf16.msra.mxu0 %v2458_v31  ;;  %v376_v31 = vld [vmem:[%s2824_s12 + $0x168] sm:$0xff] }
  0x7a   : > { %2176 = vmatpush3.bf16.msra.mxu1 %v2459_v32  ;;  %2225 = vmatprep.subr.bf16.mxu0 %v2460_v41  ;;  %v2481_v32 = vld [vmem:[%s2830_s10 + $0x128] sm:$0xff]   ;;  %v2004_v38 = vcombine.high %v372_v30, %v376_v31  ;;  %v2486_v41 = vld [vmem:[%s2830_s10 + $0x1f0] sm:$0xff]  }
  0x7b   : > { %2289 = vmatprep.subr.bf16.mxu1 %v2462_v43  ;;  %v383_v43 = vld [vmem:[%s2824_s12 + $0x1a0] sm:$0xff]  ;;  %v392_v58 = vld [vmem:[%s2824_s12 + $0x1e8] sm:$0xff] }
  0x7c   : > { %1260 = vmatmul.mubr.bf16.vlgmr.msra.gmra.mrb[0].mxu0 %v1961_v36  ;;  %v1995_v36 = vcombine.low %v364_v17, %v368_v18  ;;  %v2019_v4 = vcombine.low %v388_v57, %v392_v58  ;;  %v350_v17 = vld [vmem:[%s2824_s12 + $0x98] sm:$0xff] }
  0x7d   : > { %1357 = vmatmul.mubr.bf16.vlgmr.msra.gmra.mrb[0].mxu1 %v1963_v39  ;;  %2226 = vmatpush3.bf16.msra.mxu0 %v2461_v42  ;;  %v2484_v39 = vld [vmem:[%s2830_s10 + $0x170] sm:$0xff]   ;;  %v379_v42 = vld [vmem:[%s2824_s12 + $0x180] sm:$0xff]  ;;  %v354_v18 = vld [vmem:[%s2824_s12 + $0xb8] sm:$0xff] }
  0x7e   : > { %2290 = vmatpush3.bf16.msra.mxu1 %v2463_v44  ;;  %1267 = vmatprep.mubr.bf16.mxu0 %v1970_v47  ;;  %v2487_v44 = vld [vmem:[%s2830_s10 + $0x1b0] sm:$0xff]   ;;  %v2488_v47 = vld [vmem:[%s2830_s10 + $0x178] sm:$0xff]   ;;  %v2009_v59 = vcombine.low %v379_v42, %v383_v43  ;;  %v1983_v28 = vcombine.low %v350_v17, %v354_v18 }
  0x7f   : > { %1364 = vmatprep.mubr.bf16.mxu1 %v1972_v50  ;;  %2227 = vmatprep.subr.bf16.mxu0 %v2464_v51  ;;  %v2003_v50 = vcombine.low %v372_v30, %v376_v31  ;;  %v2010_v51 = vcombine.high %v379_v42, %v383_v43  ;;  %v365_v31 = vld [vmem:[%s2824_s12 + $0x110] sm:$0xff]  ;;  %v378_v42 = vld [vmem:[%s2824_s12 + $0x178] sm:$0xff] }
  0x80   : > { %2291 = vmatprep.subr.bf16.mxu1 %v2466_v55  ;;  %v387_v55 = vld [vmem:[%s2824_s12 + $0x1c0] sm:$0xff] }
  0x81   : > { %2228 = vmatpush3.bf16.msra.mxu0 %v2465_v53  ;;  %v2012_v53 = vcombine.high %v380_v45, %v384_v46 }
  0x82   : > { %2292 = vmatpush3.bf16.msra.mxu1 %v2467_v56  ;;  %2229 = vmatprep.subr.bf16.mxu0 %v2468_v63  ;;  %v391_v56 = vld [vmem:[%s2824_s12 + $0x1e0] sm:$0xff]  ;;  %v333_v63 = vld [vmem:[%s2824_s12 + $0x10] sm:$0xff] }
  0x83   : > { %2293 = vmatprep.subr.bf16.mxu1 %v2470_v1  ;;  %v334_v1 = vld [vmem:[%s2824_s12 + $0x18] sm:$0xff] }
  0x84   : > { %1268 = vmatmul.mubr.bf16.gmra.mrb[4].mxu0 %v1969_v52  ;;  %v2490_v52 = vld [vmem:[%s2830_s10 + $0x1f8] sm:$0xff]  }
  0x85   : > { %1365 = vmatmul.mubr.bf16.gmra.mrb[4].mxu1 %v1971_v54  ;;  %1275 = vmatprep.mubr.bf16.mxu0 %v1978_v61  ;;  %v2491_v54 = vld [vmem:[%s2830_s10 + $0x1b8] sm:$0xff]   ;;  %v2018_v61 = vcombine.high %v387_v55, %v391_v56 }
  0x86   : > { %1372 = vmatprep.mubr.bf16.mxu1 %v1980_v62  ;;  %2230 = vmatpush3.bf16.msra.mxu0 %v2469_v0  ;;  %v2020_v62 = vcombine.high %v388_v57, %v392_v58  ;;  %v337_v0 = vld [vmem:[%s2824_s12 + $0x30] sm:$0xff]  ;;  %v390_v57 = vld [vmem:[%s2824_s12 + $0x1d8] sm:$0xff] }
  0x87   : > { %2294 = vmatpush3.bf16.msra.mxu1 %v2471_v2  ;;  %2231 = vmatprep.subr.bf16.mxu0 %v2472_v11  ;;  %v338_v2 = vld [vmem:[%s2824_s12 + $0x38] sm:$0xff]  ;;  %v1966_v5 = vcombine.high %v333_v63, %v337_v0  ;;  %v1965_v11 = vcombine.low %v333_v63, %v337_v0 }
  0x88   : > { %2295 = vmatprep.subr.bf16.mxu1 %v2474_v13  ;;  %v1968_v6 = vcombine.high %v334_v1, %v338_v2  ;;  %v394_v58 = vld [vmem:[%s2824_s12 + $0x1f8] sm:$0xff] }
  0x89   : > { %v2023_v0 = vcombine.low %v390_v57, %v394_v58 }
  0x8a   : > { %2232 = vmatpush3.bf16.msra.mxu0 %v2473_v12  ;;  %v1967_v12 = vcombine.low %v334_v1, %v338_v2 }
  0x8b   : > { %2296 = vmatpush3.bf16.msra.mxu1 %v2475_v14  ;;  %2233 = vmatprep.subr.bf16.mxu0 %v2476_v19 }
  0x8c   : > { %1276 = vmatmul.mubr.bf16.gmra.mrb[8].mxu0 %v1977_v3  ;;  %2297 = vmatprep.subr.bf16.mxu1 %v2478_v24  ;;  %v2017_v3 = vcombine.low %v387_v55, %v391_v56  ;;  %v361_v24 = vld [vmem:[%s2824_s12 + $0xf0] sm:$0xff] }
  0x8d   : > { %1373 = vmatmul.mubr.bf16.gmra.mrb[8].mxu1 %v1979_v7  ;;  %1283 = vmatprep.mubr.bf16.mxu0 %v1986_v8  ;;  %v341_v7 = vld [vmem:[%s2824_s12 + $0x50] sm:$0xff] }
  0x8e   : > { %1380 = vmatprep.mubr.bf16.mxu1 %v1988_v10  ;;  %2234 = vmatpush3.bf16.msra.mxu0 %v2477_v21  ;;  %v345_v8 = vld [vmem:[%s2824_s12 + $0x70] sm:$0xff]  ;;  %v346_v10 = vld [vmem:[%s2824_s12 + $0x78] sm:$0xff]  ;;  %v1982_v21 = vcombine.high %v349_v15, %v353_v16 }
  0x8f   : > { %2298 = vmatpush3.bf16.msra.mxu1 %v2479_v26  ;;  %2235 = vmatprep.subr.bf16.mxu0 %v2480_v29  ;;  %v1974_v13 = vcombine.high %v341_v7, %v345_v8  ;;  %v1976_v14 = vcombine.high %v342_v9, %v346_v10  ;;  %v1973_v19 = vcombine.low %v341_v7, %v345_v8  ;;  %v362_v26 = vld [vmem:[%s2824_s12 + $0xf8] sm:$0xff]  ;;  %v389_v55 = vld [vmem:[%s2824_s12 + $0x1d0] sm:$0xff] }
  0x90   : > { %2299 = vmatprep.subr.bf16.mxu1 %v2482_v33  ;;  %v366_v33 = vld [vmem:[%s2824_s12 + $0x118] sm:$0xff]  ;;  %v393_v56 = vld [vmem:[%s2824_s12 + $0x1f0] sm:$0xff] }
  0x91   : > { %v2021_v63 = vcombine.low %v389_v55, %v393_v56 }
  0x92   : > { %2236 = vmatpush3.bf16.msra.mxu0 %v2481_v32  ;;  %v369_v32 = vld [vmem:[%s2824_s12 + $0x130] sm:$0xff] }
  0x93   : > { %2300 = vmatpush3.bf16.msra.mxu1 %v2483_v34  ;;  %2237 = vmatprep.subr.bf16.mxu0 %v2484_v39  ;;  %v370_v34 = vld [vmem:[%s2824_s12 + $0x138] sm:$0xff]  ;;  %v373_v39 = vld [vmem:[%s2824_s12 + $0x150] sm:$0xff]  ;;  %v1997_v43 = vcombine.low %v365_v31, %v369_v32 }
  0x94   : > { %1284 = vmatmul.mubr.bf16.gmra.mrb[12].mxu0 %v1985_v20  ;;  %2301 = vmatprep.subr.bf16.mxu1 %v2486_v41  ;;  %v1975_v20 = vcombine.low %v342_v9, %v346_v10  ;;  %v374_v41 = vld [vmem:[%s2824_s12 + $0x158] sm:$0xff] }
  0x95   : > { %1381 = vmatmul.mubr.bf16.gmra.mrb[12].mxu1 %v1987_v22  ;;  %1291 = vmatprep.mubr.bf16.mxu0 %v1994_v23  ;;  %v1984_v22 = vcombine.high %v350_v17, %v354_v18  ;;  %v357_v23 = vld [vmem:[%s2824_s12 + $0xd0] sm:$0xff]  ;;  %v2008_v46 = vcombine.high %v374_v41, %v378_v42 }
  0x96   : > { %1388 = vmatprep.mubr.bf16.mxu1 %v1996_v25  ;;  %2238 = vmatpush3.bf16.msra.mxu0 %v2485_v40  ;;  %v358_v25 = vld [vmem:[%s2824_s12 + $0xd8] sm:$0xff]  ;;  %v1990_v29 = vcombine.high %v357_v23, %v361_v24  ;;  %v377_v40 = vld [vmem:[%s2824_s12 + $0x170] sm:$0xff] }
  0x97   : > { %2302 = vmatpush3.bf16.msra.mxu1 %v2487_v44  ;;  %2239 = vmatprep.subr.bf16.mxu0 %v2488_v47  ;;  %v1992_v30 = vcombine.high %v358_v25, %v362_v26  ;;  %v1999_v44 = vcombine.low %v366_v33, %v370_v34  ;;  %v2006_v45 = vcombine.high %v373_v39, %v377_v40  ;;  %v381_v47 = vld [vmem:[%s2824_s12 + $0x190] sm:$0xff] }
  0x98   : > { %2303 = vmatprep.subr.bf16.mxu1 %v2490_v52  ;;  %v2007_v52 = vcombine.low %v374_v41, %v378_v42 }
  0x9a   : > { %2240 = vmatpush3.bf16.msra.mxu0 %v2489_v49  ;;  %v382_v49 = vld [vmem:[%s2824_s12 + $0x198] sm:$0xff] }
  0x9b   : > { %2304 = vmatpush3.bf16.msra.mxu1 %v2491_v54 }
  0x9c   : > { %1292 = vmatmul.mubr.bf16.gmra.mrb[16].mxu0 %v1993_v35  ;;  %v1989_v35 = vcombine.low %v357_v23, %v361_v24 }
  0x9d   : > { %1389 = vmatmul.mubr.bf16.gmra.mrb[16].mxu1 %v1995_v36  ;;  %1299 = vmatprep.mubr.bf16.mxu0 %v2002_v37  ;;  %v1991_v36 = vcombine.low %v358_v25, %v362_v26  ;;  %v1998_v37 = vcombine.high %v365_v31, %v369_v32 }
  0x9e   : > { %1396 = vmatprep.mubr.bf16.mxu1 %v2004_v38  ;;  %v2000_v38 = vcombine.high %v366_v33, %v370_v34 }
  0xa4   : > { %1300 = vmatmul.mubr.bf16.gmra.mrb[20].mxu0 %v2001_v48  ;;  %v385_v48 = vld [vmem:[%s2824_s12 + $0x1b0] sm:$0xff] }
  0xa5   : > { %1397 = vmatmul.mubr.bf16.gmra.mrb[20].mxu1 %v2003_v50  ;;  %1307 = vmatprep.mubr.bf16.mxu0 %v2010_v51  ;;  %v386_v50 = vld [vmem:[%s2824_s12 + $0x1b8] sm:$0xff]  ;;  %v2005_v51 = vcombine.low %v373_v39, %v377_v40 }
  0xa6   : > { %1404 = vmatprep.mubr.bf16.mxu1 %v2012_v53  ;;  %v2014_v53 = vcombine.high %v381_v47, %v385_v48  ;;  %v2016_v54 = vcombine.high %v382_v49, %v386_v50 }
  0xac   : > { %1308 = vmatmul.mubr.bf16.gmra.mrb[24].mxu0 %v2009_v59  ;;  %v2013_v59 = vcombine.low %v381_v47, %v385_v48 }
  0xad   : > { %1405 = vmatmul.mubr.bf16.gmra.mrb[24].mxu1 %v2011_v60  ;;  %1315 = vmatprep.mubr.bf16.mxu0 %v2018_v61  ;;  %v2015_v60 = vcombine.low %v382_v49, %v386_v50  ;;  %v2022_v61 = vcombine.high %v389_v55, %v393_v56 }
  0xae   : > { %1412 = vmatprep.mubr.bf16.mxu1 %v2020_v62  ;;  %v2024_v62 = vcombine.high %v390_v57, %v394_v58 }
  0xb4   : > { %1316 = vmatmul.mubr.bf16.gmra.mrb[28].mxu0 %v2017_v3 }
  0xb5   : > { %1413 = vmatmul.mubr.bf16.gmra.mrb[28].mxu1 %v2019_v4  ;;  %1453 = vmatprep.mubr.bf16.mxu0 %v1966_v5 }
  0xb6   : > { %1550 = vmatprep.mubr.bf16.mxu1 %v1968_v6 }
  0xbc   : > { %1454 = vmatmul.mubr.bf16.vlgmr.msra.gmra.mrb[32].mxu0 %v1965_v11 }
  0xbd   : > { %1551 = vmatmul.mubr.bf16.vlgmr.msra.gmra.mrb[32].mxu1 %v1967_v12  ;;  %1461 = vmatprep.mubr.bf16.mxu0 %v1974_v13 }
  0xbe   : > { %1558 = vmatprep.mubr.bf16.mxu1 %v1976_v14 }
  0xc4   : > { %1462 = vmatmul.mubr.bf16.gmra.mrb[36].mxu0 %v1973_v19 }
  0xc5   : > { %1559 = vmatmul.mubr.bf16.gmra.mrb[36].mxu1 %v1975_v20  ;;  %1469 = vmatprep.mubr.bf16.mxu0 %v1982_v21 }
  0xc6   : > { %1566 = vmatprep.mubr.bf16.mxu1 %v1984_v22 }
  0xcc   : > { %1470 = vmatmul.mubr.bf16.gmra.mrb[40].mxu0 %v1981_v27 }
  0xcd   : > { %1567 = vmatmul.mubr.bf16.gmra.mrb[40].mxu1 %v1983_v28  ;;  %1477 = vmatprep.mubr.bf16.mxu0 %v1990_v29 }
  0xce   : > { %1574 = vmatprep.mubr.bf16.mxu1 %v1992_v30 }
  0xd4   : > { %1478 = vmatmul.mubr.bf16.gmra.mrb[44].mxu0 %v1989_v35 }
  0xd5   : > { %1575 = vmatmul.mubr.bf16.gmra.mrb[44].mxu1 %v1991_v36  ;;  %1485 = vmatprep.mubr.bf16.mxu0 %v1998_v37 }
  0xd6   : > { %1582 = vmatprep.mubr.bf16.mxu1 %v2000_v38 }
  0xdc   : > { %1486 = vmatmul.mubr.bf16.gmra.mrb[48].mxu0 %v1997_v43 }
  0xdd   : > { %1583 = vmatmul.mubr.bf16.gmra.mrb[48].mxu1 %v1999_v44  ;;  %1493 = vmatprep.mubr.bf16.mxu0 %v2006_v45 }
  0xde   : > { %1590 = vmatprep.mubr.bf16.mxu1 %v2008_v46 }
  0xe4   : > { %1494 = vmatmul.mubr.bf16.gmra.mrb[52].mxu0 %v2005_v51 }
  0xe5   : > { %1591 = vmatmul.mubr.bf16.gmra.mrb[52].mxu1 %v2007_v52  ;;  %1501 = vmatprep.mubr.bf16.mxu0 %v2014_v53 }
  0xe6   : > { %1598 = vmatprep.mubr.bf16.mxu1 %v2016_v54 }
  0xec   : > { %1502 = vmatmul.mubr.bf16.gmra.mrb[56].mxu0 %v2013_v59 }
  0xed   : > { %1599 = vmatmul.mubr.bf16.gmra.mrb[56].mxu1 %v2015_v60  ;;  %1509 = vmatprep.mubr.bf16.mxu0 %v2022_v61 }
  0xee   : > { %1606 = vmatprep.mubr.bf16.mxu1 %v2024_v62 }
  0xf4   : > { %1510 = vmatmul.mubr.bf16.gmra.mrb[60].mxu0 %v2021_v63 }
  0xf5   : > { %1607 = vmatmul.mubr.bf16.gmra.mrb[60].mxu1 %v2023_v0 }
 0x14f   : > { %v2113_v1 = vpop.f32.mrb[0].mxu0 }
 0x150   : > { %v2177_v2 = vpop.f32.mrb[0].mxu1  ;;  %v2114_v3 = vpop.f32.mrb[1].mxu0 }
 0x151   : > { %v2115_v4 = vadd.f32 %v2114_v3, %v2113_v1  ;;  %v2178_v5 = vpop.f32.mrb[1].mxu1  ;;  %v2116_v6 = vpop.f32.mrb[2].mxu0 }
 0x152   : > { %v2179_v7 = vadd.f32 %v2178_v5, %v2177_v2  ;;  %v2180_v8 = vpop.f32.mrb[2].mxu1  ;;  %v2117_v9 = vpop.f32.mrb[3].mxu0 }
 0x153   : > { %v2118_v10 = vadd.f32 %v2117_v9, %v2116_v6  ;;  %v2181_v11 = vpop.f32.mrb[3].mxu1 }
 0x154   : > { %v2965_v12 = vadd.f32 %v2179_v7, %v2115_v4  ;;  %v2182_v13 = vadd.f32 %v2181_v11, %v2180_v8 }
 0x156   : > { %v2967_v14 = vadd.f32 %v2182_v13, %v2118_v10 }
 0x157   : > { %v2119_v15 = vpop.f32.mrb[4].mxu0 }
 0x158   : > { %v2183_v16 = vpop.f32.mrb[4].mxu1  ;;  %v2120_v17 = vpop.f32.mrb[5].mxu0 }
 0x159   : > { %v2121_v18 = vadd.f32 %v2120_v17, %v2119_v15  ;;  %v2184_v19 = vpop.f32.mrb[5].mxu1  ;;  %v2122_v20 = vpop.f32.mrb[6].mxu0 }
 0x15a   : > { %v2185_v21 = vadd.f32 %v2184_v19, %v2183_v16  ;;  %v2186_v22 = vpop.f32.mrb[6].mxu1  ;;  %v2123_v23 = vpop.f32.mrb[7].mxu0 }
 0x15b   : > { %v2124_v24 = vadd.f32 %v2123_v23, %v2122_v20  ;;  %v2187_v25 = vpop.f32.mrb[7].mxu1 }
 0x15c   : > { %v2969_v26 = vadd.f32 %v2185_v21, %v2121_v18  ;;  %v2188_v27 = vadd.f32 %v2187_v25, %v2186_v22 }
 0x15e   : > { %v2971_v28 = vadd.f32 %v2188_v27, %v2124_v24 }
 0x15f   : > { %v2125_v29 = vpop.f32.mrb[8].mxu0 }
 0x160   : > { %v2189_v30 = vpop.f32.mrb[8].mxu1  ;;  %v2126_v31 = vpop.f32.mrb[9].mxu0 }
 0x161   : > { %v2127_v32 = vadd.f32 %v2126_v31, %v2125_v29  ;;  %v2190_v33 = vpop.f32.mrb[9].mxu1  ;;  %v2128_v34 = vpop.f32.mrb[10].mxu0 }
 0x162   : > { %v2191_v35 = vadd.f32 %v2190_v33, %v2189_v30  ;;  %v2192_v36 = vpop.f32.mrb[10].mxu1  ;;  %v2129_v37 = vpop.f32.mrb[11].mxu0 }
 0x163   : > { %v2130_v38 = vadd.f32 %v2129_v37, %v2128_v34  ;;  %v2193_v39 = vpop.f32.mrb[11].mxu1 }
 0x164   : > { %v2973_v40 = vadd.f32 %v2191_v35, %v2127_v32  ;;  %v2194_v41 = vadd.f32 %v2193_v39, %v2192_v36 }
 0x166   : > { %v2975_v42 = vadd.f32 %v2194_v41, %v2130_v38 }
 0x167   : > { %v2131_v43 = vpop.f32.mrb[12].mxu0 }
 0x168   : > { %v2195_v44 = vpop.f32.mrb[12].mxu1  ;;  %v2132_v45 = vpop.f32.mrb[13].mxu0 }
 0x169   : > { %v2133_v46 = vadd.f32 %v2132_v45, %v2131_v43  ;;  %v2196_v47 = vpop.f32.mrb[13].mxu1  ;;  %v2134_v48 = vpop.f32.mrb[14].mxu0 }
 0x16a   : > { %v2197_v49 = vadd.f32 %v2196_v47, %v2195_v44  ;;  %v2198_v50 = vpop.f32.mrb[14].mxu1  ;;  %v2135_v51 = vpop.f32.mrb[15].mxu0 }
 0x16b   : > { %v2136_v52 = vadd.f32 %v2135_v51, %v2134_v48  ;;  %v2199_v53 = vpop.f32.mrb[15].mxu1 }
 0x16c   : > { %v2977_v54 = vadd.f32 %v2197_v49, %v2133_v46  ;;  %v2200_v55 = vadd.f32 %v2199_v53, %v2198_v50 }
 0x16e   : > { %v2979_v56 = vadd.f32 %v2200_v55, %v2136_v52 }
 0x16f   : > { %v2137_v57 = vpop.f32.mrb[16].mxu0 }
 0x170   : > { %v2201_v58 = vpop.f32.mrb[16].mxu1  ;;  %v2138_v59 = vpop.f32.mrb[17].mxu0 }
 0x171   : > { %v2139_v60 = vadd.f32 %v2138_v59, %v2137_v57  ;;  %v2202_v61 = vpop.f32.mrb[17].mxu1  ;;  %v2140_v62 = vpop.f32.mrb[18].mxu0 }
 0x172   : > { %v2203_v63 = vadd.f32 %v2202_v61, %v2201_v58  ;;  %v2204_v0 = vpop.f32.mrb[18].mxu1  ;;  %v2141_v1 = vpop.f32.mrb[19].mxu0 }
 0x173   : > { %v2142_v2 = vadd.f32 %v2141_v1, %v2140_v62  ;;  %v2205_v3 = vpop.f32.mrb[19].mxu1 }
 0x174   : > { %v2981_v4 = vadd.f32 %v2203_v63, %v2139_v60  ;;  %v2206_v5 = vadd.f32 %v2205_v3, %v2204_v0 }
 0x176   : > { %v2983_v6 = vadd.f32 %v2206_v5, %v2142_v2 }
 0x177   : > { %v2143_v7 = vpop.f32.mrb[20].mxu0 }
 0x178   : > { %v2207_v8 = vpop.f32.mrb[20].mxu1  ;;  %v2144_v9 = vpop.f32.mrb[21].mxu0 }
 0x179   : > { %v2145_v10 = vadd.f32 %v2144_v9, %v2143_v7  ;;  %v2208_v11 = vpop.f32.mrb[21].mxu1  ;;  %v2146_v13 = vpop.f32.mrb[22].mxu0  ;;  %v315_v7 = vld [vmem:[#allocation2] sm:$0xff] }
 0x17a   : > { %v2209_v15 = vadd.f32 %v2208_v11, %v2207_v8  ;;  %v2210_v16 = vpop.f32.mrb[22].mxu1  ;;  %v2147_v17 = vpop.f32.mrb[23].mxu0  ;;  %v316_v11 = vld [vmem:[#allocation2 + $0x8] sm:$0xff] }
 0x17b   : > { %v2148_v18 = vadd.f32 %v2147_v17, %v2146_v13  ;;  %v2211_v19 = vpop.f32.mrb[23].mxu1 }
 0x17c   : > { %v2985_v20 = vadd.f32 %v2209_v15, %v2145_v10  ;;  %v2212_v21 = vadd.f32 %v2211_v19, %v2210_v16 }
 0x17e   : > { %v2987_v22 = vadd.f32 %v2212_v21, %v2148_v18 }
 0x17f   : > { %v2149_v23 = vpop.f32.mrb[24].mxu0 }
 0x180   : > { %v2213_v24 = vpop.f32.mrb[24].mxu1  ;;  %v2150_v25 = vpop.f32.mrb[25].mxu0 }
 0x181   : > { %v2151_v27 = vadd.f32 %v2150_v25, %v2149_v23  ;;  %v2214_v29 = vpop.f32.mrb[25].mxu1  ;;  %v2152_v30 = vpop.f32.mrb[26].mxu0 }
 0x182   : > { %v2215_v31 = vadd.f32 %v2214_v29, %v2213_v24  ;;  %v2216_v32 = vpop.f32.mrb[26].mxu1  ;;  %v2153_v33 = vpop.f32.mrb[27].mxu0 }
 0x183   : > { %v2154_v34 = vadd.f32 %v2153_v33, %v2152_v30  ;;  %v2217_v35 = vpop.f32.mrb[27].mxu1 }
 0x184   : > { %v2989_v36 = vadd.f32 %v2215_v31, %v2151_v27  ;;  %v2218_v37 = vadd.f32 %v2217_v35, %v2216_v32  ;;  %v318_v35 = vld [vmem:[#allocation2 + $0x18] sm:$0xff] }
 0x186   : > { %v2991_v38 = vadd.f32 %v2218_v37, %v2154_v34 }
 0x187   : > { %v2155_v39 = vpop.f32.mrb[28].mxu0 }
 0x188   : > { %v2219_v41 = vpop.f32.mrb[28].mxu1  ;;  %v2156_v43 = vpop.f32.mrb[29].mxu0 }
 0x189   : > { %v2157_v44 = vadd.f32 %v2156_v43, %v2155_v39  ;;  %v2220_v45 = vpop.f32.mrb[29].mxu1  ;;  %v2158_v46 = vpop.f32.mrb[30].mxu0 }
 0x18a   : > { %v2221_v47 = vadd.f32 %v2220_v45, %v2219_v41  ;;  %v2222_v48 = vpop.f32.mrb[30].mxu1  ;;  %v2159_v49 = vpop.f32.mrb[31].mxu0 }
 0x18b   : > { %v2160_v50 = vadd.f32 %v2159_v49, %v2158_v46  ;;  %v2223_v51 = vpop.f32.mrb[31].mxu1 }
 0x18c   : > { %v2993_v52 = vadd.f32 %v2221_v47, %v2157_v44  ;;  %v2224_v53 = vadd.f32 %v2223_v51, %v2222_v48 }
 0x18e   : > { %v2995_v55 = vadd.f32 %v2224_v53, %v2160_v50 }
 0x18f   : > { %v2241_v57 = vpop.f32.mrb[32].mxu0 }
 0x190   : > { %v2305_v58 = vpop.f32.mrb[32].mxu1  ;;  %v2242_v59 = vpop.f32.mrb[33].mxu0 }
 0x191   : > { %v2243_v60 = vadd.f32 %v2242_v59, %v2241_v57  ;;  %v2306_v61 = vpop.f32.mrb[33].mxu1  ;;  %v2244_v62 = vpop.f32.mrb[34].mxu0 }
 0x192   : > { %v2307_v63 = vadd.f32 %v2306_v61, %v2305_v58  ;;  %v2308_v0 = vpop.f32.mrb[34].mxu1  ;;  %v2245_v1 = vpop.f32.mrb[35].mxu0  ;;  %v320_v61 = vld [vmem:[#allocation2 + $0x28] sm:$0xff] }
 0x193   : > { %v1456_v2 = vadd.f32 %v2243_v60, %v2965_v12  ;;  %v2246_v3 = vadd.f32 %v2245_v1, %v2244_v62  ;;  %v2309_v5 = vpop.f32.mrb[35].mxu1 }
 0x194   : > { %v2310_v8 = vadd.f32 %v2309_v5, %v2308_v0 }
 0x195   : > { %v1553_v9 = vadd.f32 %v2307_v63, %v1456_v2  ;;  %v1459_v10 = vadd.f32 %v2246_v3, %v2967_v14  ;;  %v317_v14 = vld [vmem:[#allocation2 + $0x10] sm:$0xff] }
 0x197   : > { %v1615_v13 = vadd.f32 %v1553_v9, %v315_v7  ;;  %v1556_v15 = vadd.f32 %v2310_v8, %v1459_v10  ;;  %v2247_v16 = vpop.f32.mrb[36].mxu0 }
 0x198   : > { %v2311_v17 = vpop.f32.mrb[36].mxu1  ;;  %v2248_v18 = vpop.f32.mrb[37].mxu0 }
 0x199   : > { %1631 = vst [vmem:[#allocation2] sm:$0xff] %v1615_v13  ;;  %v1616_v19 = vadd.f32 %v1556_v15, %v316_v11  ;;  %v2249_v21 = vadd.f32 %v2248_v18, %v2247_v16  ;;  %v2312_v23 = vpop.f32.mrb[37].mxu1  ;;  %v2250_v24 = vpop.f32.mrb[38].mxu0 }
 0x19a   : > { %v2313_v25 = vadd.f32 %v2312_v23, %v2311_v17  ;;  %v2314_v12 = vpop.f32.mrb[38].mxu1  ;;  %v2251_v27 = vpop.f32.mrb[39].mxu0 }
 0x19b   : > { %1632 = vst [vmem:[#allocation2 + $0x8] sm:$0xff] %v1616_v19  ;;  %v1464_v29 = vadd.f32 %v2249_v21, %v2969_v26  ;;  %v2252_v30 = vadd.f32 %v2251_v27, %v2250_v24  ;;  %v2315_v31 = vpop.f32.mrb[39].mxu1  ;;  %v322_v19 = vld [vmem:[#allocation2 + $0x38] sm:$0xff] }
 0x19c   : > { %v2316_v32 = vadd.f32 %v2315_v31, %v2314_v12 }
 0x19d   : > { %v1561_v33 = vadd.f32 %v2313_v25, %v1464_v29  ;;  %v1467_v34 = vadd.f32 %v2252_v30, %v2971_v28  ;;  %v319_v28 = vld [vmem:[#allocation2 + $0x20] sm:$0xff] }
 0x19f   : > { %v1617_v37 = vadd.f32 %v1561_v33, %v317_v14  ;;  %v1564_v39 = vadd.f32 %v2316_v32, %v1467_v34  ;;  %v2253_v41 = vpop.f32.mrb[40].mxu0 }
 0x1a0   : > { %v2317_v43 = vpop.f32.mrb[40].mxu1  ;;  %v2254_v44 = vpop.f32.mrb[41].mxu0 }
 0x1a1   : > { %1633 = vst [vmem:[#allocation2 + $0x10] sm:$0xff] %v1617_v37  ;;  %v1618_v45 = vadd.f32 %v1564_v39, %v318_v35  ;;  %v2255_v46 = vadd.f32 %v2254_v44, %v2253_v41  ;;  %v2318_v47 = vpop.f32.mrb[41].mxu1  ;;  %v2256_v48 = vpop.f32.mrb[42].mxu0 }
 0x1a2   : > { %v2319_v49 = vadd.f32 %v2318_v47, %v2317_v43  ;;  %v2320_v26 = vpop.f32.mrb[42].mxu1  ;;  %v2257_v50 = vpop.f32.mrb[43].mxu0  ;;  %v324_v43 = vld [vmem:[#allocation2 + $0x48] sm:$0xff] }
 0x1a3   : > { %1634 = vst [vmem:[#allocation2 + $0x18] sm:$0xff] %v1618_v45  ;;  %v1472_v51 = vadd.f32 %v2255_v46, %v2973_v40  ;;  %v2258_v53 = vadd.f32 %v2257_v50, %v2256_v48  ;;  %v2321_v57 = vpop.f32.mrb[43].mxu1 }
 0x1a4   : > { %v2322_v58 = vadd.f32 %v2321_v57, %v2320_v26 }
 0x1a5   : > { %v1569_v59 = vadd.f32 %v2319_v49, %v1472_v51  ;;  %v1475_v60 = vadd.f32 %v2258_v53, %v2975_v42  ;;  %v321_v42 = vld [vmem:[#allocation2 + $0x30] sm:$0xff] }
 0x1a7   : > { %v1619_v62 = vadd.f32 %v1569_v59, %v319_v28  ;;  %v1572_v63 = vadd.f32 %v2322_v58, %v1475_v60  ;;  %v2259_v0 = vpop.f32.mrb[44].mxu0 }
 0x1a8   : > { %v2323_v1 = vpop.f32.mrb[44].mxu1  ;;  %v2260_v2 = vpop.f32.mrb[45].mxu0 }
 0x1a9   : > { %1635 = vst [vmem:[#allocation2 + $0x20] sm:$0xff] %v1619_v62  ;;  %v1620_v3 = vadd.f32 %v1572_v63, %v320_v61  ;;  %v2261_v5 = vadd.f32 %v2260_v2, %v2259_v0  ;;  %v2324_v7 = vpop.f32.mrb[45].mxu1  ;;  %v2262_v8 = vpop.f32.mrb[46].mxu0  ;;  %v326_v63 = vld [vmem:[#allocation2 + $0x58] sm:$0xff] }
 0x1aa   : > { %v2325_v9 = vadd.f32 %v2324_v7, %v2323_v1  ;;  %v2326_v40 = vpop.f32.mrb[46].mxu1  ;;  %v2263_v10 = vpop.f32.mrb[47].mxu0 }
 0x1ab   : > { %1636 = vst [vmem:[#allocation2 + $0x28] sm:$0xff] %v1620_v3  ;;  %v1480_v11 = vadd.f32 %v2261_v5, %v2977_v54  ;;  %v2264_v13 = vadd.f32 %v2263_v10, %v2262_v8  ;;  %v2327_v15 = vpop.f32.mrb[47].mxu1 }
 0x1ac   : > { %v2328_v16 = vadd.f32 %v2327_v15, %v2326_v40 }
 0x1ad   : > { %v1577_v17 = vadd.f32 %v2325_v9, %v1480_v11  ;;  %v1483_v18 = vadd.f32 %v2264_v13, %v2979_v56  ;;  %v323_v56 = vld [vmem:[#allocation2 + $0x40] sm:$0xff] }
 0x1af   : > { %v1621_v21 = vadd.f32 %v1577_v17, %v321_v42  ;;  %v1580_v23 = vadd.f32 %v2328_v16, %v1483_v18  ;;  %v2265_v24 = vpop.f32.mrb[48].mxu0 }
 0x1b0   : > { %v2329_v25 = vpop.f32.mrb[48].mxu1  ;;  %v2266_v12 = vpop.f32.mrb[49].mxu0 }
 0x1b1   : > { %1637 = vst [vmem:[#allocation2 + $0x30] sm:$0xff] %v1621_v21  ;;  %v1622_v27 = vadd.f32 %v1580_v23, %v322_v19  ;;  %v2267_v29 = vadd.f32 %v2266_v12, %v2265_v24  ;;  %v2330_v30 = vpop.f32.mrb[49].mxu1  ;;  %v2268_v31 = vpop.f32.mrb[50].mxu0  ;;  %v328_v19 = vld [vmem:[#allocation2 + $0x68] sm:$0xff] }
 0x1b2   : > { %v2331_v14 = vadd.f32 %v2330_v30, %v2329_v25  ;;  %v2332_v54 = vpop.f32.mrb[50].mxu1  ;;  %v2269_v32 = vpop.f32.mrb[51].mxu0 }
 0x1b3   : > { %1638 = vst [vmem:[#allocation2 + $0x38] sm:$0xff] %v1622_v27  ;;  %v1488_v33 = vadd.f32 %v2267_v29, %v2981_v4  ;;  %v2270_v34 = vadd.f32 %v2269_v32, %v2268_v31  ;;  %v2333_v35 = vpop.f32.mrb[51].mxu1 }
 0x1b4   : > { %v2334_v37 = vadd.f32 %v2333_v35, %v2332_v54 }
 0x1b5   : > { %v1585_v39 = vadd.f32 %v2331_v14, %v1488_v33  ;;  %v1491_v41 = vadd.f32 %v2270_v34, %v2983_v6  ;;  %v325_v6 = vld [vmem:[#allocation2 + $0x50] sm:$0xff] }
 0x1b7   : > { %v1623_v44 = vadd.f32 %v1585_v39, %v323_v56  ;;  %v1588_v45 = vadd.f32 %v2334_v37, %v1491_v41  ;;  %v2271_v46 = vpop.f32.mrb[52].mxu0  ;;  %v330_v39 = vld [vmem:[#allocation2 + $0x78] sm:$0xff] }
 0x1b8   : > { %v2335_v47 = vpop.f32.mrb[52].mxu1  ;;  %v2272_v48 = vpop.f32.mrb[53].mxu0 }
 0x1b9   : > { %1639 = vst [vmem:[#allocation2 + $0x40] sm:$0xff] %v1623_v44  ;;  %v1624_v49 = vadd.f32 %v1588_v45, %v324_v43  ;;  %v2273_v26 = vadd.f32 %v2272_v48, %v2271_v46  ;;  %v2336_v50 = vpop.f32.mrb[53].mxu1  ;;  %v2274_v51 = vpop.f32.mrb[54].mxu0  ;;  %v3014_v45 = vld [vmem:[#allocation2] sm:$0xff] (!%p2089_p12)  ;;  %v3016_v46 = vld [vmem:[#allocation2 + $0x8] sm:$0xff] (!%p2089_p12) }
 0x1ba   : > { %v2337_v53 = vadd.f32 %v2336_v50, %v2335_v47  ;;  %v2338_v4 = vpop.f32.mrb[54].mxu1  ;;  %v2275_v57 = vpop.f32.mrb[55].mxu0  ;;  %v3020_v47 = vld [vmem:[#allocation2 + $0x18] sm:$0xff] (!%p2089_p12)  ;;  %v1691_v48 = vmul.f32 (!%p2089_p12), %v3014_v45, %v3014_v45  ;;  %v3030_v50 = vld [vmem:[#allocation2 + $0x20] sm:$0xff] (!%p2089_p12) }
 0x1bb   : > { %1640 = vst [vmem:[#allocation2 + $0x48] sm:$0xff] %v1624_v49  ;;  %v1496_v28 = vadd.f32 %v2273_v26, %v2985_v20  ;;  %v2276_v58 = vadd.f32 %v2275_v57, %v2274_v51  ;;  %v2339_v59 = vpop.f32.mrb[55].mxu1  ;;  %v1692_v49 = vmul.f32 (!%p2089_p12), %v3016_v46, %v3016_v46  ;;  %v3035_v57 = vld [vmem:[#allocation2 + $0x28] sm:$0xff] (!%p2089_p12) }
 0x1bc   : > { %v2340_v60 = vadd.f32 %v2339_v59, %v2338_v4 }
 0x1bd   : > { %v1593_v61 = vadd.f32 %v2337_v53, %v1496_v28  ;;  %v1499_v62 = vadd.f32 %v2276_v58, %v2987_v22  ;;  %v327_v22 = vld [vmem:[#allocation2 + $0x60] sm:$0xff]  ;;  %v1694_v53 = vmul.f32 (!%p2089_p12), %v3020_v47, %v3020_v47  ;;  %v1707_v4 = vadd.f32 (!%p2089_p12), %v1692_v49, %v1691_v48 }
 0x1be   : > { %v1695_v58 = vmul.f32 (!%p2089_p12), %v3030_v50, %v3030_v50 }
 0x1bf   : > { %v1625_v0 = vadd.f32 %v1593_v61, %v325_v6  ;;  %v1596_v1 = vadd.f32 %v2340_v60, %v1499_v62  ;;  %v2277_v2 = vpop.f32.mrb[56].mxu0  ;;  %v3040_v6 = vld [vmem:[#allocation2 + $0x30] sm:$0xff] (!%p2089_p12)  ;;  %v1696_v61 = vmul.f32 (!%p2089_p12), %v3035_v57, %v3035_v57 }
 0x1c0   : > { %v2341_v3 = vpop.f32.mrb[56].mxu1  ;;  %v2278_v5 = vpop.f32.mrb[57].mxu0 }
 0x1c1   : > { %1641 = vst [vmem:[#allocation2 + $0x50] sm:$0xff] %v1625_v0  ;;  %v1626_v7 = vadd.f32 %v1596_v1, %v326_v63  ;;  %v2279_v8 = vadd.f32 %v2278_v5, %v2277_v2  ;;  %v2342_v9 = vpop.f32.mrb[57].mxu1  ;;  %v2280_v40 = vpop.f32.mrb[58].mxu0  ;;  %v3045_v63 = vld [vmem:[#allocation2 + $0x38] sm:$0xff] (!%p2089_p12)  ;;  %v1697_v1 = vmul.f32 (!%p2089_p12), %v3040_v6, %v3040_v6 }
 0x1c2   : > { %v2343_v10 = vadd.f32 %v2342_v9, %v2341_v3  ;;  %v2344_v20 = vpop.f32.mrb[58].mxu1  ;;  %v2281_v11 = vpop.f32.mrb[59].mxu0  ;;  %v3050_v3 = vld [vmem:[#allocation2 + $0x40] sm:$0xff] (!%p2089_p12)  ;;  %v3055_v9 = vld [vmem:[#allocation2 + $0x48] sm:$0xff] (!%p2089_p12) }
 0x1c3   : > { %1642 = vst [vmem:[#allocation2 + $0x58] sm:$0xff] %v1626_v7  ;;  %v1504_v13 = vadd.f32 %v2279_v8, %v2989_v36  ;;  %v2282_v15 = vadd.f32 %v2281_v11, %v2280_v40  ;;  %v2345_v42 = vpop.f32.mrb[59].mxu1  ;;  %v1698_v7 = vmul.f32 (!%p2089_p12), %v3045_v63, %v3045_v63 }
 0x1c4   : > { %v2346_v16 = vadd.f32 %v2345_v42, %v2344_v20 }
 0x1c5   : > { %v1601_v17 = vadd.f32 %v2343_v10, %v1504_v13  ;;  %v1507_v18 = vadd.f32 %v2282_v15, %v2991_v38  ;;  %v329_v38 = vld [vmem:[#allocation2 + $0x70] sm:$0xff]  ;;  %v1699_v10 = vmul.f32 (!%p2089_p12), %v3050_v3, %v3050_v3  ;;  %v1700_v15 = vmul.f32 (!%p2089_p12), %v3055_v9, %v3055_v9 }
 0x1c7   : > { %v1627_v21 = vadd.f32 %v1601_v17, %v327_v22  ;;  %v1604_v23 = vadd.f32 %v2346_v16, %v1507_v18  ;;  %v2283_v24 = vpop.f32.mrb[60].mxu0 }
 0x1c8   : > { %v2347_v25 = vpop.f32.mrb[60].mxu1  ;;  %v2284_v12 = vpop.f32.mrb[61].mxu0  ;;  %v3060_v11 = vld [vmem:[#allocation2 + $0x50] sm:$0xff] (!%p2089_p12) }
 0x1c9   : > { %1643 = vst [vmem:[#allocation2 + $0x60] sm:$0xff] %v1627_v21  ;;  %v1628_v27 = vadd.f32 %v1604_v23, %v328_v19  ;;  %v2285_v29 = vadd.f32 %v2284_v12, %v2283_v24  ;;  %v2348_v30 = vpop.f32.mrb[61].mxu1  ;;  %v2286_v31 = vpop.f32.mrb[62].mxu0  ;;  %v1701_v17 = vmul.f32 (!%p2089_p12), %v3060_v11, %v3060_v11 }
 0x1ca   : > { %v2349_v14 = vadd.f32 %v2348_v30, %v2347_v25  ;;  %v2350_v36 = vpop.f32.mrb[62].mxu1  ;;  %v2287_v54 = vpop.f32.mrb[63].mxu0  ;;  %v3065_v22 = vld [vmem:[#allocation2 + $0x58] sm:$0xff] (!%p2089_p12) }
 0x1cb   : > { %1644 = vst [vmem:[#allocation2 + $0x68] sm:$0xff] %v1628_v27  ;;  %v1512_v32 = vadd.f32 %v2285_v29, %v2993_v52  ;;  %v2288_v33 = vadd.f32 %v2287_v54, %v2286_v31  ;;  %v2351_v34 = vpop.f32.mrb[63].mxu1  ;;  %v3018_v52 = vld [vmem:[#allocation2 + $0x10] sm:$0xff] (!%p2089_p12)  ;;  %v1702_v23 = vmul.f32 (!%p2089_p12), %v3065_v22, %v3065_v22 }
 0x1cc   : > { %v2352_v35 = vadd.f32 %v2351_v34, %v2350_v36  ;;  %v1693_v26 = vmul.f32 (!%p2089_p12), %v3018_v52, %v3018_v52 }
 0x1cd   : > { %v1609_v56 = vadd.f32 %v2349_v14, %v1512_v32  ;;  %v1515_v37 = vadd.f32 %v2288_v33, %v2995_v55  ;;  %1650 = sbr.rel (%p2089_p12) target bundleno = 545 (0x221), region = 52  ;;  %v1669_v55 = vadd.f32 (!%p2089_p12), %v3016_v46, %v3014_v45 }
 0x1ce   : > { %v1708_v59 = vadd.f32 (!%p2089_p12), %v1707_v4, %v1693_v26 }
 0x1cf   : > { %v1629_v41 = vadd.f32 %v1609_v56, %v329_v38  ;;  %v1612_v43 = vadd.f32 %v2352_v35, %v1515_v37  ;;  %v1670_v51 = vadd.f32 (!%p2089_p12), %v1669_v55, %v3018_v52 }
 0x1d0   : > { %v1709_v62 = vadd.f32 (!%p2089_p12), %v1708_v59, %v1694_v53  ;;  %v3070_v19 = vld [vmem:[#allocation2 + $0x60] sm:$0xff] (!%p2089_p12) }
 0x1d1   : > { %1645 = vst [vmem:[#allocation2 + $0x70] sm:$0xff] %v1629_v41  ;;  %v1630_v44 = vadd.f32 %v1612_v43, %v330_v39  ;;  %v1671_v28 = vadd.f32 (!%p2089_p12), %v1670_v51, %v3020_v47  ;;  %v1703_v27 = vmul.f32 (!%p2089_p12), %v3070_v19, %v3070_v19 }
 0x1d2   : > { %v1710_v2 = vadd.f32 (!%p2089_p12), %v1709_v62, %v1695_v58  ;;  %v3075_v25 = vld [vmem:[#allocation2 + $0x68] sm:$0xff] (!%p2089_p12) }
 0x1d3   : > { %1646 = vst [vmem:[#allocation2 + $0x78] sm:$0xff] %v1630_v44  ;;  %v1672_v60 = vadd.f32 (!%p2089_p12), %v1671_v28, %v3030_v50  ;;  %v1704_v14 = vmul.f32 (!%p2089_p12), %v3075_v25, %v3075_v25 }
 0x1d4   : > { %v1711_v8 = vadd.f32 %v1710_v2, %v1696_v61 }
 0x1d5   : > { %v1673_v0 = vadd.f32 %v1672_v60, %v3035_v57 }
 0x1d6   : > { %v1712_v20 = vadd.f32 %v1711_v8, %v1697_v1  ;;  %v1667_v8 = vld [vmem:[%s3184_s2] sm:$0x1] }
 0x1d7   : > { %v1674_v5 = vadd.f32 %v1673_v0, %v3040_v6 }
 0x1d8   : > { %v1713_v42 = vadd.f32 %v1712_v20, %v1698_v7  ;;  %v3080_v30 = vld [vmem:[#allocation2 + $0x70] sm:$0xff] }
 0x1d9   : > { %v1675_v40 = vadd.f32 %v1674_v5, %v3045_v63  ;;  %v1705_v33 = vmul.f32 %v3080_v30, %v3080_v30  ;;  %v1751_v5 = vlaneseq }
 0x1da   : > { %v1714_v18 = vadd.f32 %v1713_v42, %v1699_v10  ;;  %v3085_v54 = vld [vmem:[#allocation2 + $0x78] sm:$0xff] }
 0x1db   : > { %v1676_v13 = vadd.f32 %v1675_v40, %v3050_v3  ;;  %v1706_v35 = vmul.f32 %v3085_v54, %v3085_v54  ;;  %v1752_v7 = vshrl.u32 %v1751_v5, 7 }
 0x1dc   : > { %v1715_v24 = vadd.f32 %v1714_v18, %v1700_v15 }
 0x1dd   : > { %v1677_v16 = vadd.f32 %v1676_v13, %v3055_v9  ;;  %v1753_v40 = vsub.s32 0, %v1752_v7 }
 0x1de   : > { %v1716_v29 = vadd.f32 %v1715_v24, %v1701_v17 }
 0x1df   : > { %v1678_v21 = vadd.f32 %v1677_v16, %v3060_v11 }
 0x1e0   : > { %v1717_v36 = vadd.f32 %v1716_v29, %v1702_v23 }
 0x1e1   : > { %v1679_v12 = vadd.f32 %v1678_v21, %v3065_v22 }
 0x1e2   : > { %v1718_v34 = vadd.f32 %v1717_v36, %v1703_v27 }
 0x1e3   : > { %v1680_v31 = vadd.f32 %v1679_v12, %v3070_v19 }
 0x1e4   : > { %v1719_v56 = vadd.f32 %v1718_v34, %v1704_v14 }
 0x1e5   : > { %v1681_v32 = vadd.f32 %v1680_v31, %v3075_v25 }
 0x1e6   : > { %v1720_v39 = vadd.f32 %v1719_v56, %v1705_v33 }
 0x1e7   : > { %v1682_v38 = vadd.f32 %v1681_v32, %v3080_v30 }
 0x1e8   : > { %v1721_v43 = vadd.f32 %v1720_v39, %v1706_v35 }
 0x1e9   : > { %v1683_v37 = vadd.f32 %v1682_v38, %v3085_v54 }
 0x1ea   : > { %v1722_v55 = vrot.slane %v1721_v43, 4 }
 0x1eb   : > { %v1684_v41 = vrot.slane %v1683_v37, 4 }
 0x1ec   : > { %v1723_v49 = vadd.f32 %v1722_v55, %v1721_v43 }
 0x1ed   : > { %v1685_v44 = vadd.f32 %v1684_v41, %v1683_v37 }
 0x1ee   : > { %v1724_v51 = vrot.slane %v1723_v49, 2 }
 0x1ef   : > { %v1686_v48 = vrot.slane %v1685_v44, 2 }
 0x1f0   : > { %v1725_v4 = vadd.f32 %v1724_v51, %v1723_v49 }
 0x1f1   : > { %v1687_v26 = vadd.f32 %v1686_v48, %v1685_v44 }
 0x1f2   : > { %v1726_v58 = vrot.slane %v1725_v4, 1 }
 0x1f3   : > { %v1688_v53 = vrot.slane %v1687_v26, 1 }
 0x1f4   : > { %v1727_v60 = vadd.f32 %v1726_v58, %v1725_v4 }
 0x1f5   : > { %v1689_v28 = vadd.f32 %v1688_v53, %v1687_v26 }
 0x1f6   : > { %v1728_v62 = vmul.f32 0.0078125, %v1727_v60 }
 0x1f7   : > { %v3094_v59 = vmul.f32 0.0078125, %v1689_v28 }
 0x1f9   : > { %v1729_v61 = vmul.f32 %v3094_v59, %v3094_v59  ;;  %v1734_v20 = vsub.f32 %v3014_v45, %v3094_v59  ;;  %v1735_v13 = vsub.f32 %v3016_v46, %v3094_v59  ;;  %v1736_v42 = vsub.f32 %v3018_v52, %v3094_v59 }
 0x1fa   : > { %v1737_v16 = vsub.f32 %v3020_v47, %v3094_v59  ;;  %v1738_v17 = vsub.f32 %v3030_v50, %v3094_v59  ;;  %v1739_v18 = vsub.f32 %v3035_v57, %v3094_v59  ;;  %v1740_v21 = vsub.f32 %v3040_v6, %v3094_v59  ;;  %v2090_v57 = vld [vmem:[%s3185_s3] ss:$0 sm:$0xff] }
 0x1fb   : > { %v1730_v0 = vsub.f32 %v1728_v62, %v1729_v61  ;;  %v1741_v45 = vsub.f32 %v3045_v63, %v3094_v59  ;;  %v1742_v46 = vsub.f32 %v3050_v3, %v3094_v59  ;;  %v1743_v52 = vsub.f32 %v3055_v9, %v3094_v59 }
 0x1fc   : > { %v1744_v47 = vsub.f32 %v3060_v11, %v3094_v59  ;;  %v1745_v50 = vsub.f32 %v3065_v22, %v3094_v59  ;;  %v1746_v6 = vsub.f32 %v3070_v19, %v3094_v59  ;;  %v1747_v63 = vsub.f32 %v3075_v25, %v3094_v59 }
 0x1fd   : > { %v1731_v1 = vmax.f32 %v1730_v0, 0.0  ;;  %v1748_v3 = vsub.f32 %v3080_v30, %v3094_v59  ;;  %v1749_v9 = vsub.f32 %v3085_v54, %v3094_v59 }
 0x1ff   : > { %v1732_v2 = vadd.f32 1e-05, %v1731_v1 }
 0x201   : > { %2492 = vrsqrt.f32 %v1732_v2 }
 0x20b   : > { %v2493_v10 = vpop.eup %2492 }
 0x20c   : > { %v1750_v15 = vmul.f32 %v2493_v10, %v1667_v8 }
 0x20e   : > { %v1754_v23 = vrot.slane %v1750_v15, %v1753_v40 }
 0x210   : > { %v1755_v11 = vmul.f32 %v1754_v23, %v1734_v20  ;;  %v1756_v24 = vmul.f32 %v1754_v23, %v1735_v13  ;;  %v1757_v12 = vmul.f32 %v1754_v23, %v1736_v42  ;;  %v1758_v22 = vmul.f32 %v1754_v23, %v1737_v16 }
 0x211   : > { %v1759_v27 = vmul.f32 %v1754_v23, %v1738_v17  ;;  %v1760_v29 = vmul.f32 %v1754_v23, %v1739_v18  ;;  %v1761_v31 = vmul.f32 %v1754_v23, %v1740_v21  ;;  %v1762_v14 = vmul.f32 %v1754_v23, %v1741_v45 }
 0x212   : > { %v1777_v36 = vadd.f32 %v2090_v57, %v1755_v11  ;;  %v1778_v32 = vadd.f32 %v2090_v57, %v1756_v24  ;;  %v1779_v19 = vadd.f32 %v2090_v57, %v1757_v12  ;;  %v1780_v33 = vadd.f32 %v2090_v57, %v1758_v22 }
 0x213   : > { %v1781_v34 = vadd.f32 %v2090_v57, %v1759_v27  ;;  %v1782_v25 = vadd.f32 %v2090_v57, %v1760_v29  ;;  %v1783_v38 = vadd.f32 %v2090_v57, %v1761_v31  ;;  %v1784_v35 = vadd.f32 %v2090_v57, %v1762_v14 }
 0x214   : > { %v1793_v30 = vmax.f32 %v1777_v36, 0.0  ;;  %v1794_v56 = vmax.f32 %v1778_v32, 0.0  ;;  %v1795_v37 = vmax.f32 %v1779_v19, 0.0  ;;  %v1796_v54 = vmax.f32 %v1780_v33, 0.0 }
 0x215   : > { %v1797_v39 = vmax.f32 %v1781_v34, 0.0  ;;  %v1798_v41 = vmax.f32 %v1782_v25, 0.0  ;;  %v1799_v43 = vmax.f32 %v1783_v38, 0.0  ;;  %v1800_v44 = vmax.f32 %v1784_v35, 0.0 }
 0x216   : > { %1809 = vst [vmem:[#allocation8] sm:$0xff] %v1793_v30  ;;  %1810 = vst [vmem:[#allocation8 + $0x8] sm:$0xff] %v1794_v56  ;;  %v1763_v55 = vmul.f32 %v1754_v23, %v1742_v46  ;;  %v1764_v48 = vmul.f32 %v1754_v23, %v1743_v52  ;;  %v1765_v49 = vmul.f32 %v1754_v23, %v1744_v47 }
 0x217   : > { %1811 = vst [vmem:[#allocation8 + $0x10] sm:$0xff] %v1795_v37  ;;  %1812 = vst [vmem:[#allocation8 + $0x18] sm:$0xff] %v1796_v54  ;;  %v1766_v26 = vmul.f32 %v1754_v23, %v1745_v50  ;;  %v1767_v51 = vmul.f32 %v1754_v23, %v1746_v6  ;;  %v1768_v53 = vmul.f32 %v1754_v23, %v1747_v63 }
 0x218   : > { %1813 = vst [vmem:[#allocation8 + $0x20] sm:$0xff] %v1797_v39  ;;  %1814 = vst [vmem:[#allocation8 + $0x28] sm:$0xff] %v1798_v41  ;;  %v1769_v4 = vmul.f32 %v1754_v23, %v1748_v3  ;;  %v1770_v28 = vmul.f32 %v1754_v23, %v1749_v9  ;;  %v1785_v58 = vadd.f32 %v2090_v57, %v1763_v55 }
 0x219   : > { %1815 = vst [vmem:[#allocation8 + $0x30] sm:$0xff] %v1799_v43  ;;  %1816 = vst [vmem:[#allocation8 + $0x38] sm:$0xff] %v1800_v44  ;;  %v1786_v59 = vadd.f32 %v2090_v57, %v1764_v48  ;;  %v1787_v60 = vadd.f32 %v2090_v57, %v1765_v49  ;;  %v1788_v61 = vadd.f32 %v2090_v57, %v1766_v26 }
 0x21a   : > { %v1789_v62 = vadd.f32 %v2090_v57, %v1767_v51  ;;  %v1790_v0 = vadd.f32 %v2090_v57, %v1768_v53  ;;  %v1791_v1 = vadd.f32 %v2090_v57, %v1769_v4  ;;  %v1792_v2 = vadd.f32 %v2090_v57, %v1770_v28 }
 0x21b   : > { %v1801_v5 = vmax.f32 %v1785_v58, 0.0  ;;  %v1802_v7 = vmax.f32 %v1786_v59, 0.0  ;;  %v1803_v8 = vmax.f32 %v1787_v60, 0.0  ;;  %v1804_v40 = vmax.f32 %v1788_v61, 0.0 }
 0x21c   : > { %v1805_v10 = vmax.f32 %v1789_v62, 0.0  ;;  %v1806_v20 = vmax.f32 %v1790_v0, 0.0  ;;  %v1807_v13 = vmax.f32 %v1791_v1, 0.0  ;;  %v1808_v15 = vmax.f32 %v1792_v2, 0.0 }
 0x21d   : > { %1817 = vst [vmem:[#allocation8 + $0x40] sm:$0xff] %v1801_v5  ;;  %1818 = vst [vmem:[#allocation8 + $0x48] sm:$0xff] %v1802_v7 }
 0x21e   : > { %1819 = vst [vmem:[#allocation8 + $0x50] sm:$0xff] %v1803_v8  ;;  %1820 = vst [vmem:[#allocation8 + $0x58] sm:$0xff] %v1804_v40 }
 0x21f   : > { %1821 = vst [vmem:[#allocation8 + $0x60] sm:$0xff] %v1805_v10  ;;  %1822 = vst [vmem:[#allocation8 + $0x68] sm:$0xff] %v1806_v20 }
 0x220   : > { %1823 = vst [vmem:[#allocation8 + $0x70] sm:$0xff] %v1807_v13  ;;  %1824 = vst [vmem:[#allocation8 + $0x78] sm:$0xff] %v1808_v15 }
 0x221 PF: > { %p3138_p4 = scmp.eq.s32.totalorder %s1946_s21, 1  ;;  %s2648_s5 = smov [#allocation8]  }
 0x222   : > { %s1833_s7 = sshll.u32 %s2648_s5, 4  ;;  %s1834_s7 = int_to_ptr.vmem [resolvable:$true] %s1833_s7 }
 0x223   : > { %s2554_s30 = scalar_lea.vmem %s1834_s7, 2048  ;;  %p2561_p0 = scmp.lt.s32.totalorder %s1834_s7, %s1834_s7 }
 0x224   : > { %p2555_p8 = scmp.ne.s32.totalorder %s1834_s7, %s2554_s30  ;;  %p2562_p10 = scmp.lt.s32.totalorder %s2554_s30, %s2554_s30 }
 0x226   : > { %p2556_p2 = pnand %p2555_p8, %p3138_p4  ;;  %p2563_p5 = por %p2562_p10, %p2561_p0 }
 0x228   : > { %p2557_p3 = pneg %p2556_p2 }
 0x22a   : > { %p2564_p6 = pnand %p2563_p5, %p2557_p3 }
 0x22c   : > { %2567 = shalt.err (!%p2564_p6)
}
 0x22d   : > { %s2568_s21 = scalar_lea.hbm %s3186_s4, 2048 }
 0x22e   : > { %p2569_p11 = scmp.ne.s32.totalorder %s3186_s4, %s2568_s21  ;;  %p2574_p7 = scmp.lt.u32.totalorder %s2568_s21, %s3186_s4 }
 0x230   : > { %p2570_p13 = pnand %p2569_p11, %p3138_p4 }
 0x232   : > { %p2571_p1 = pneg %p2570_p13 }
 0x234   : > { %p2576_p9 = pnand %p2574_p7, %p2571_p1 }
 0x236   : > { %2579 = shalt.err (!%p2576_p9)
}
 0x237   : > { %s2649_s6 = smov 128   ;;  %s2650_s8 = smov 8  }
 0x238   : > { %2358 = dma.vmem_to_hbm [thread:$0]  (%p3138_p4), %s1834_s7, 2048, %s3186_s4, [#allocation5], %s2649_s6, %s2649_s6, %s2650_s8  }
 0x239   : > { %2613 = dma.done.wait (%p3138_p4), [#allocation5], 2048  }
 0x23a   : > { %2615 = vsyncadd (%p3138_p4), [#allocation5], 4294965248 }
 0x23b PF: > { %s21_s20 = sadd.s32 1, %s2638_s20   ;;  %s3195_s15 = smov %s2622_s16 }
 0x23c   : > { %p18_p12 = scmp.ge.s32.totalorder %s21_s20, 4   ;;  %s3196_s16 = smov %s2626_s17 }
 0x23d   : > { %s3197_s17 = smov %s2727_s27  ;;  %s3198_s18 = smov %s2634_s19 }
 0x23e   : > { %s3199_s19 = smov %s3201_s22  ;;  %20 = sbr.rel (!%p18_p12) target bundleno = 7 (0x7), region = 101 }
 0x245   :  { %1849 = vsyncpa [#allocation4], 1 }
 0x246   :  { %1851 = vsyncpa [#allocation4 + $0x1], 1 }
 0x247   :  { %1852 = vsyncpa [#allocation7], 1 }
 0x248   :  { %1854 = vsyncpa [#allocation7 + $0x1], 1 }
 0x249   :  { %1855 = vsyncpa [#allocation5], 1 }
 0x24a   :  { %1857 = vsyncpa [#allocation5 + $0x1], 1 }

</bundles_post_ra>
